<compile_context>
chip_gen: v5e
topology: v5e:2x2
jax: 0.10.0
libtpu: 0.0.40
codegen_flags: <defaults>
</compile_context>

<pallas_src>
import functools
import math

import jax
import jax.numpy as jnp
from jax.experimental import pallas as pl
from jax.experimental.pallas import tpu as pltpu


# ------------------------- tiling helpers -------------------------

_TM = 256         # rows (B*S) tile target
_TN = 512         # output-feature tile target (multiple of 256 for v6e/v7x MXU)
_TF = 512         # FFN hidden (reduction) tile target
_TSK = 512        # attention key/value sequence tile target
_VMEM_LIMIT = 48 * 1024 * 1024   # explicit scoped-VMEM limit with headroom (v7x: 64 MiB phys)
_MASK_VALUE = -1e30


def _pick_tile(dim, target, mult):
    """Largest multiple of `mult` <= target that divides dim; full dim if dim <= target."""
    if dim <= target:
        return dim
    t = (target // mult) * mult
    while t >= mult:
        if dim % t == 0:
            return t
        t -= mult
    return dim


def _cparams(dims):
    return pltpu.CompilerParams(
        dimension_semantics=dims, vmem_limit_bytes=_VMEM_LIMIT)


# ------------------------- RMSNorm (standalone: input/output norm) -------------------------

def _rmsnorm_kernel(x_ref, w_ref, o_ref, *, eps):
    x = x_ref[...].astype(jnp.float32)
    ms = jnp.mean(x * x, axis=-1, keepdims=True)
    y = x * jax.lax.rsqrt(ms + eps)
    o_ref[...] = (y * w_ref[...].astype(jnp.float32)).astype(o_ref.dtype)


def rmsnorm(x, w, eps=1e-6):
    B, S, D = x.shape
    M = B * S
    tm = _pick_tile(M, _TM, 8)
    out = pl.pallas_call(
        functools.partial(_rmsnorm_kernel, eps=eps),
        out_shape=jax.ShapeDtypeStruct((M, D), x.dtype),
        grid=(M // tm,),
        in_specs=[
            pl.BlockSpec((tm, D), lambda i: (i, 0)),
            pl.BlockSpec((1, D), lambda i: (0, 0)),
        ],
        out_specs=pl.BlockSpec((tm, D), lambda i: (i, 0)),
        compiler_params=_cparams(("parallel",)),
    )(x.reshape(M, D), w.reshape(1, D))
    return out.reshape(B, S, D)


# ------------------------- fused RMSNorm + matmul (QKV / Q projections) -------------------------

def _norm_matmul_kernel(x_ref, nw_ref, w_ref, o_ref, *, eps):
    x = x_ref[...].astype(jnp.float32)
    ms = jnp.mean(x * x, axis=-1, keepdims=True)
    xn = (x * jax.lax.rsqrt(ms + eps)
          * nw_ref[...].astype(jnp.float32)).astype(w_ref.dtype)
    o_ref[...] = jnp.dot(xn, w_ref[...],
                         preferred_element_type=jnp.float32).astype(o_ref.dtype)


def norm_matmul(x2, norm_w, w, eps=1e-6):
    """RMSNorm(x) @ w ;  x2: [M, D], w: [D, N].  D (reduction) kept whole per block."""
    M, D = x2.shape
    N = w.shape[1]
    tm = _pick_tile(M, _TM, 8)
    tn = _pick_tile(N, _TN, 128)
    return pl.pallas_call(
        functools.partial(_norm_matmul_kernel, eps=eps),
        out_shape=jax.ShapeDtypeStruct((M, N), x2.dtype),
        grid=(M // tm, N // tn),
        in_specs=[
            pl.BlockSpec((tm, D), lambda i, j: (i, 0)),
            pl.BlockSpec((1, D), lambda i, j: (0, 0)),
            pl.BlockSpec((D, tn), lambda i, j: (0, j)),
        ],
        out_specs=pl.BlockSpec((tm, tn), lambda i, j: (i, j)),
        compiler_params=_cparams(("parallel", "parallel")),
    )(x2, norm_w.reshape(1, D), w)


def _matmul_kernel(x_ref, w_ref, o_ref):
    o_ref[...] = jnp.dot(x_ref[...], w_ref[...],
                         preferred_element_type=jnp.float32).astype(o_ref.dtype)


def matmul(x2, w):
    """Plain x2 @ w (used for the un-normed cross-attention K|V projection of memory)."""
    M, K = x2.shape
    N = w.shape[1]
    tm = _pick_tile(M, _TM, 8)
    tn = _pick_tile(N, _TN, 128)
    return pl.pallas_call(
        _matmul_kernel,
        out_shape=jax.ShapeDtypeStruct((M, N), x2.dtype),
        grid=(M // tm, N // tn),
        in_specs=[
            pl.BlockSpec((tm, K), lambda i, j: (i, 0)),
            pl.BlockSpec((K, tn), lambda i, j: (0, j)),
        ],
        out_specs=pl.BlockSpec((tm, tn), lambda i, j: (i, j)),
        compiler_params=_cparams(("parallel", "parallel")),
    )(x2, w)


# ------------------------- fused FFN: x + down(silu(gate(RMSNorm(x)))) -------------------------

def _ffn_kernel(x_ref, nw_ref, wg_ref, wd_ref, o_ref, xn_scr, acc_scr, *, eps):
    f = pl.program_id(1)

    @pl.when(f == 0)
    def _():
        x = x_ref[...].astype(jnp.float32)
        ms = jnp.mean(x * x, axis=-1, keepdims=True)
        xn_scr[...] = (x * jax.lax.rsqrt(ms + eps)
                       * nw_ref[...].astype(jnp.float32)).astype(xn_scr.dtype)
        acc_scr[...] = jnp.zeros(acc_scr.shape, acc_scr.dtype)

    h = jnp.dot(xn_scr[...], wg_ref[...], preferred_element_type=jnp.float32)
    h = h * jax.nn.sigmoid(h)                                   # SiLU (f32)
    acc_scr[...] += jnp.dot(h.astype(wd_ref.dtype), wd_ref[...],
                            preferred_element_type=jnp.float32)

    @pl.when(f == pl.num_programs(1) - 1)
    def _():
        o_ref[...] = (acc_scr[...]
                      + x_ref[...].astype(jnp.float32)).astype(o_ref.dtype)


def feed_forward_residual(x, norm_w, wg, wd, eps=1e-6):
    B, S, D = x.shape
    F = wg.shape[1]
    M = B * S
    tm = _pick_tile(M, _TM, 8)
    tf = _pick_tile(F, _TF, 128)
    out = pl.pallas_call(
        functools.partial(_ffn_kernel, eps=eps),
        out_shape=jax.ShapeDtypeStruct((M, D), x.dtype),
        grid=(M // tm, F // tf),
        in_specs=[
            pl.BlockSpec((tm, D), lambda i, f: (i, 0)),
            pl.BlockSpec((1, D), lambda i, f: (0, 0)),
            pl.BlockSpec((D, tf), lambda i, f: (0, f)),
            pl.BlockSpec((tf, D), lambda i, f: (f, 0)),
        ],
        out_specs=pl.BlockSpec((tm, D), lambda i, f: (i, 0)),
        scratch_shapes=[
            pltpu.VMEM((tm, D), x.dtype),       # normed activations (compute dtype)
            pltpu.VMEM((tm, D), jnp.float32),   # f32 accumulator
        ],
        compiler_params=_cparams(("parallel", "arbitrary")),
    )(x.reshape(M, D), norm_w.reshape(1, D), wg, wd)
    return out.reshape(B, S, D)


# ------------------------- flash attention (GQA via BlockSpec, in-kernel RoPE) ----------------

def _flash_attn_kernel(*refs, scale, causal, use_rope):
    if use_rope:
        (q_ref, k_ref, v_ref, cosq_ref, sinq_ref, cosk_ref, sink_ref,
         o_ref, m_scr, l_scr, acc_scr) = refs
    else:
        q_ref, k_ref, v_ref, o_ref, m_scr, l_scr, acc_scr = refs

    j = pl.program_id(1)
    rep, SQ, hd = q_ref.shape
    RQ = rep * SQ
    tk = k_ref.shape[1]

    @pl.when(j == 0)
    def _():
        m_scr[...] = jnp.full(m_scr.shape, _MASK_VALUE, m_scr.dtype)
        l_scr[...] = jnp.zeros(l_scr.shape, l_scr.dtype)
        acc_scr[...] = jnp.zeros(acc_scr.shape, acc_scr.dtype)

    q = q_ref[...].reshape(RQ, hd)      # rep query heads stacked on the row axis
    k = k_ref[0]                        # [tk, hd] (shared across the rep query heads)
    v = v_ref[0]

    if use_rope:
        # Interleaved (even/odd pair) RoPE, torchtune convention.  The pair swap is a
        # tiny hd x hd permutation matmul (MXU), avoiding cross-lane shuffles.
        rr = jax.lax.broadcasted_iota(jnp.int32, (hd, hd), 0)
        cc = jax.lax.broadcasted_iota(jnp.int32, (hd, hd), 1)
        perm = (cc == rr + 1 - 2 * (rr % 2)).astype(jnp.float32)
        qf = q.astype(jnp.float32)
        kf = k.astype(jnp.float32)
        cq = jnp.concatenate([cosq_ref[...]] * rep, axis=0)     # [RQ, hd]
        sq = jnp.concatenate([sinq_ref[...]] * rep, axis=0)
        qf = qf * cq + jnp.dot(qf, perm, preferred_element_type=jnp.float32) * sq
        kf = (kf * cosk_ref[...]
              + jnp.dot(kf, perm, preferred_element_type=jnp.float32) * sink_ref[...])
        q = qf.astype(q_ref.dtype)      # back to bf16 for the MXU
        k = kf.astype(k_ref.dtype)

    s = jnp.dot(q, k.T, preferred_element_type=jnp.float32) * scale    # [RQ, tk] f32

    if causal:
        qpos = jax.lax.broadcasted_iota(jnp.int32, (RQ, tk), 0) % SQ
        kpos = jax.lax.broadcasted_iota(jnp.int32, (RQ, tk), 1) + j * tk
        s = jnp.where(kpos <= qpos, s, _MASK_VALUE)

    m_prev = m_scr[...]
    m_new = jnp.maximum(m_prev, jnp.max(s, axis=-1, keepdims=True))
    alpha = jnp.exp(m_prev - m_new)
    p = jnp.exp(s - m_new)
    l_scr[...] = alpha * l_scr[...] + jnp.sum(p, axis=-1, keepdims=True)
    acc_scr[...] = alpha * acc_scr[...] + jnp.dot(
        p.astype(v.dtype), v, preferred_element_type=jnp.float32)
    m_scr[...] = m_new

    @pl.when(j == pl.num_programs(1) - 1)
    def _():
        inv = pl.reciprocal(l_scr[...], approx=True)
        o_ref[...] = (acc_scr[...] * inv).reshape(rep, SQ, hd).astype(o_ref.dtype)


def flash_attention(q, k, v, *, causal, rope=None):
    """q: [B*H, Sq, hd]; k/v: [B*KV, Sk, hd].  GQA: each grid step gets one resident
    KV head block and the `rep` query heads that share it (no jnp.repeat / no copy)."""
    BH, SQ, hd = q.shape
    BKV, SK, _ = k.shape
    rep = BH // BKV
    tk = _pick_tile(SK, _TSK, 128)
    scale = 1.0 / math.sqrt(hd)
    use_rope = rope is not None

    in_specs = [
        pl.BlockSpec((rep, SQ, hd), lambda i, j: (i, 0, 0)),
        pl.BlockSpec((1, tk, hd), lambda i, j: (i, j, 0)),
        pl.BlockSpec((1, tk, hd), lambda i, j: (i, j, 0)),
    ]
    args = [q, k, v]
    if use_rope:
        cos_t, sin_t = rope
        in_specs += [
            pl.BlockSpec((SQ, hd), lambda i, j: (0, 0)),
            pl.BlockSpec((SQ, hd), lambda i, j: (0, 0)),
            pl.BlockSpec((tk, hd), lambda i, j: (j, 0)),
            pl.BlockSpec((tk, hd), lambda i, j: (j, 0)),
        ]
        args += [cos_t[:SQ], sin_t[:SQ], cos_t[:SK], sin_t[:SK]]

    return pl.pallas_call(
        functools.partial(_flash_attn_kernel, scale=scale, causal=causal,
                          use_rope=use_rope),
        out_shape=jax.ShapeDtypeStruct((BH, SQ, hd), q.dtype),
        grid=(BKV, SK // tk),
        in_specs=in_specs,
        out_specs=pl.BlockSpec((rep, SQ, hd), lambda i, j: (i, 0, 0)),
        scratch_shapes=[
            pltpu.VMEM((rep * SQ, 1), jnp.float32),    # running max
            pltpu.VMEM((rep * SQ, 1), jnp.float32),    # running denom
            pltpu.VMEM((rep * SQ, hd), jnp.float32),   # output accumulator
        ],
        compiler_params=_cparams(("parallel", "arbitrary")),
    )(*args)


# ------------------------- output projection + residual (reduces over heads) ------------------

def _out_proj_kernel(a_ref, wo_ref, res_ref, o_ref, acc_scr):
    h = pl.program_id(2)

    @pl.when(h == 0)
    def _():
        acc_scr[...] = jnp.zeros(acc_scr.shape, acc_scr.dtype)

    acc_scr[...] += jnp.dot(a_ref[0], wo_ref[...],
                            preferred_element_type=jnp.float32)

    @pl.when(h == pl.num_programs(2) - 1)
    def _():
        o_ref[0] = (acc_scr[...] + res_ref[0].astype(jnp.float32)).astype(o_ref.dtype)


def out_proj_residual(attn, wo, residual, *, nhead):
    """residual + attn @ wo, with the head dimension as an in-kernel reduction axis.
    attn is the per-head [B*H, Sq, hd] layout straight from the attention kernel,
    so no [B,H,S,hd]->[B,S,H*hd] transpose is materialized in HBM."""
    BH, SQ, hd = attn.shape
    B = BH // nhead
    D = wo.shape[1]
    tn = _pick_tile(D, _TN, 128)
    return pl.pallas_call(
        _out_proj_kernel,
        out_shape=jax.ShapeDtypeStruct((B, SQ, D), residual.dtype),
        grid=(B, D // tn, nhead),
        in_specs=[
            pl.BlockSpec((1, SQ, hd), lambda b, n, h: (b * nhead + h, 0, 0)),
            pl.BlockSpec((hd, tn), lambda b, n, h: (h, n)),
            pl.BlockSpec((1, SQ, tn), lambda b, n, h: (b, 0, n)),
        ],
        out_specs=pl.BlockSpec((1, SQ, tn), lambda b, n, h: (b, 0, n)),
        scratch_shapes=[pltpu.VMEM((SQ, tn), jnp.float32)],
        compiler_params=_cparams(("parallel", "parallel", "arbitrary")),
    )(attn, wo, residual)


# ------------------------- plain-JAX glue -------------------------

def rope_tables(max_seq_len, dim, base=10000.0):
    """Interleave-expanded cos / (sign-baked) sin tables for in-kernel RoPE."""
    theta = 1.0 / (base ** (jnp.arange(0, dim, 2, dtype=jnp.float32) / dim))
    pos = jnp.arange(max_seq_len, dtype=jnp.float32)
    ang = pos[:, None] * theta[None, :]                       # [S, dim/2]
    cos = jnp.repeat(jnp.cos(ang), 2, axis=-1)                # [S, dim]
    sin = jnp.sin(ang)
    sin_signed = jnp.stack([-sin, sin], axis=-1).reshape(max_seq_len, dim)
    return cos, sin_signed


def _split_heads(x2, B, S, n, hd):
    # [B*S, n*hd] -> [B*n, S, hd]
    return x2.reshape(B, S, n, hd).transpose(0, 2, 1, 3).reshape(B * n, S, hd)


def self_attn_sublayer(x, p, cfg, rope):
    B, S, D = x.shape
    H, KV, hd = cfg["nhead"], cfg["num_kv_heads"], cfg["head_dim"]
    qkv = norm_matmul(x.reshape(B * S, D), p["sa_norm"], p["sa_wqkv"])
    q = _split_heads(qkv[:, : H * hd], B, S, H, hd)
    k = _split_heads(qkv[:, H * hd:(H + KV) * hd], B, S, KV, hd)
    v = _split_heads(qkv[:, (H + KV) * hd:], B, S, KV, hd)
    a = flash_attention(q, k, v, causal=cfg["is_causal"], rope=rope)
    h = out_proj_residual(a, p["sa_wo"], x, nhead=H)
    return feed_forward_residual(h, p["sa_mlp_norm"], p["sa_mlp_wg"], p["sa_mlp_wd"])


def cross_attn_sublayer(x, memory, p, cfg):
    B, S, D = x.shape
    Sk = memory.shape[1]
    H, KV, hd = cfg["nhead"], cfg["num_kv_heads"], cfg["head_dim"]
    q2 = norm_matmul(x.reshape(B * S, D), p["ca_norm"], p["ca_wq"])
    kv = matmul(memory.reshape(B * Sk, D), p["ca_wkv"])       # memory is NOT normed
    q = _split_heads(q2, B, S, H, hd)
    k = _split_heads(kv[:, : KV * hd], B, Sk, KV, hd)
    v = _split_heads(kv[:, KV * hd:], B, Sk, KV, hd)
    a = flash_attention(q, k, v, causal=False, rope=None)
    h = out_proj_residual(a, p["ca_wo"], x, nhead=H)
    return feed_forward_residual(h, p["ca_mlp_norm"], p["ca_mlp_wg"], p["ca_mlp_wd"])


def transformer_decoder(tgt, memory, params, cfg):
    dtype = cfg.get("dtype", jnp.bfloat16)
    x = rmsnorm(tgt.astype(dtype), params["input_norm"])
    memory = memory.astype(dtype)
    # nn.Dropout after input_norm -> identity (eval-mode semantics).
    for lp in params["layers"]:
        x = self_attn_sublayer(x, lp, cfg, params["rope"])
        x = cross_attn_sublayer(x, memory, lp, cfg)
    return rmsnorm(x, params["output_norm"])


# ------------------------- parameter init -------------------------

def xavier_uniform(key, fan_in, fan_out, dtype):
    bound = math.sqrt(6.0 / (fan_in + fan_out))
    return jax.random.uniform(key, (fan_in, fan_out), jnp.float32,
                              -bound, bound).astype(dtype)


def default_linear(key, fan_in, fan_out, dtype):
    bound = 1.0 / math.sqrt(fan_in)
    return jax.random.uniform(key, (fan_in, fan_out), jnp.float32,
                              -bound, bound).astype(dtype)


def init_params(key, cfg):
    D = cfg["d_model"]
    H, KV, hd, F = cfg["nhead"], cfg["num_kv_heads"], cfg["head_dim"], cfg["dim_feedforward"]
    dtype = cfg.get("dtype", jnp.bfloat16)

    layers = []
    for _ in range(cfg["num_layers"]):
        key, *ks = jax.random.split(key, 13)
        (k_sq, k_sk, k_sv, k_so, k_cq, k_ck, k_cv, k_co,
         k_g1, k_d1, k_g2, k_d2) = ks
        layers.append({
            "sa_norm": jnp.ones((D,), jnp.float32),
            "sa_mlp_norm": jnp.ones((D,), jnp.float32),
            "ca_norm": jnp.ones((D,), jnp.float32),
            "ca_mlp_norm": jnp.ones((D,), jnp.float32),
            # fused Q|K|V projection (single matmul, x read from HBM once)
            "sa_wqkv": jnp.concatenate(
                [xavier_uniform(k_sq, D, H * hd, dtype),
                 xavier_uniform(k_sk, D, KV * hd, dtype),
                 xavier_uniform(k_sv, D, KV * hd, dtype)], axis=1),
            "sa_wo": xavier_uniform(k_so, H * hd, D, dtype),
            "ca_wq": xavier_uniform(k_cq, D, H * hd, dtype),
            "ca_wkv": jnp.concatenate(
                [xavier_uniform(k_ck, D, KV * hd, dtype),
                 xavier_uniform(k_cv, D, KV * hd, dtype)], axis=1),
            "ca_wo": xavier_uniform(k_co, H * hd, D, dtype),
            "sa_mlp_wg": default_linear(k_g1, D, F, dtype),
            "sa_mlp_wd": default_linear(k_d1, F, D, dtype),
            "ca_mlp_wg": default_linear(k_g2, D, F, dtype),
            "ca_mlp_wd": default_linear(k_d2, F, D, dtype),
        })

    return {
        "input_norm": jnp.ones((D,), jnp.float32),
        "output_norm": jnp.ones((D,), jnp.float32),
        "layers": layers,
        "rope": rope_tables(cfg["max_seq_len"], hd),
    }


# ------------------------- main -------------------------

if __name__ == "__main__":
    cfg = dict(
        num_layers=2,
        d_model=32,
        nhead=4,
        num_kv_heads=2,
        head_dim=8,
        dim_feedforward=64,
        max_seq_len=32,
        is_causal=True,
        dtype=jnp.bfloat16,
    )
    B, Sq, Sk = 2, 8, 8

    key = jax.random.PRNGKey(0)
    kp, kt, km = jax.random.split(key, 3)
    params = init_params(kp, cfg)
    tgt = jax.random.normal(kt, (B, Sq, cfg["d_model"]), jnp.float32)
    memory = jax.random.normal(km, (B, Sk, cfg["d_model"]), jnp.float32)

    fwd = jax.jit(functools.partial(transformer_decoder, cfg=cfg))
    out = jax.block_until_ready(fwd(tgt, memory, params))

    assert out.shape == (B, Sq, cfg["d_model"])
    assert jnp.all(jnp.isfinite(out.astype(jnp.float32)))
    print("KERNEL_OK")
</pallas_src>

<mosaic_0001>
module attributes {stable_mosaic.version = 11 : i64} {
  func.func @_norm_matmul_kernel(%arg0: i32, %arg1: i32, %arg2: memref<16x32xbf16, #tpu.memory_space<vmem>>, %arg3: memref<1x32xf32, #tpu.memory_space<vmem>>, %arg4: memref<32x64xbf16, #tpu.memory_space<vmem>>, %arg5: memref<16x64xbf16, #tpu.memory_space<vmem>>) attributes {dimension_semantics = [#tpu.dimension_semantics<parallel>, #tpu.dimension_semantics<parallel>], iteration_bounds = array<i64: 1, 1>, scalar_prefetch = 0 : i64, scratch_operands = 0 : i64, tpu.core_type = #tpu.core_type<tc>, window_params = [{transform_indices = @transform_0, window_bounds = array<i64: 16, 32>}, {pipeline_mode = #tpu.pipeline_mode<synchronous>, transform_indices = @transform_1, window_bounds = array<i64: 1, 32>}, {transform_indices = @transform_2, window_bounds = array<i64: 32, 64>}, {transform_indices = @transform_3, window_bounds = array<i64: 16, 64>}]} {
    %c0 = arith.constant 0 : index
    %c0_0 = arith.constant 0 : index
    %0 = vector.load %arg2[%c0, %c0_0] : memref<16x32xbf16, #tpu.memory_space<vmem>>, vector<16x32xbf16>
    %1 = arith.extf %0 : vector<16x32xbf16> to vector<16x32xf32>
    %2 = arith.mulf %1, %1 : vector<16x32xf32>
    %cst = arith.constant dense<0.000000e+00> : vector<16xf32>
    %3 = vector.multi_reduction <add>, %2, %cst [1] : vector<16x32xf32> to vector<16xf32>
    %4 = vector.shape_cast %3 : vector<16xf32> to vector<16x1xf32>
    %cst_1 = arith.constant 3.200000e+01 : f32
    %5 = vector.broadcast %cst_1 : f32 to vector<16x1xf32>
    %6 = arith.divf %4, %5 : vector<16x1xf32>
    %cst_2 = arith.constant 9.99999997E-7 : f32
    %7 = vector.broadcast %cst_2 : f32 to vector<16x1xf32>
    %8 = arith.addf %6, %7 : vector<16x1xf32>
    %9 = math.rsqrt %8 : vector<16x1xf32>
    %10 = vector.broadcast %9 : vector<16x1xf32> to vector<16x32xf32>
    %11 = arith.mulf %1, %10 : vector<16x32xf32>
    %c0_3 = arith.constant 0 : index
    %c0_4 = arith.constant 0 : index
    %12 = vector.load %arg3[%c0_3, %c0_4] : memref<1x32xf32, #tpu.memory_space<vmem>>, vector<1x32xf32>
    %13 = vector.broadcast %12 : vector<1x32xf32> to vector<16x32xf32>
    %14 = arith.mulf %11, %13 : vector<16x32xf32>
    %15 = arith.truncf %14 : vector<16x32xf32> to vector<16x32xbf16>
    %c0_5 = arith.constant 0 : index
    %c0_6 = arith.constant 0 : index
    %16 = vector.load %arg4[%c0_5, %c0_6] : memref<32x64xbf16, #tpu.memory_space<vmem>>, vector<32x64xbf16>
    %cst_7 = arith.constant dense<0.000000e+00> : vector<16x64xf32>
    %17 = tpu.matmul %15, %16, %cst_7 {dimension_numbers = #tpu.dot_dimension_numbers<[1], [0], [0], [1], [0, 0, 1, 1], [], []>} : vector<16x32xbf16>, vector<32x64xbf16>, vector<16x64xf32> -> vector<16x64xf32>
    %18 = arith.truncf %17 : vector<16x64xf32> to vector<16x64xbf16>
    %c0_8 = arith.constant 0 : index
    %c0_9 = arith.constant 0 : index
    %19 = vector.load %arg5[%c0_8, %c0_9] : memref<16x64xbf16, #tpu.memory_space<vmem>>, vector<16x64xbf16>
    tpu.vector_store %arg5[%c0_8, %c0_9], %18 {strides = array<i32>} : memref<16x64xbf16, #tpu.memory_space<vmem>>, vector<16x64xbf16>,
    return
  }
  func.func @transform_0(%arg0: i32, %arg1: i32) -> (i32, i32) {
    %c0_i32 = arith.constant 0 : i32
    %c0_i32_0 = arith.constant 0 : i32
    return %arg0, %c0_i32 : i32, i32
  }
  func.func @transform_1(%arg0: i32, %arg1: i32) -> (i32, i32) {
    %c0_i32 = arith.constant 0 : i32
    %c0_i32_0 = arith.constant 0 : i32
    %c0_i32_1 = arith.constant 0 : i32
    return %c0_i32, %c0_i32_0 : i32, i32
  }
  func.func @transform_2(%arg0: i32, %arg1: i32) -> (i32, i32) {
    %c0_i32 = arith.constant 0 : i32
    %c0_i32_0 = arith.constant 0 : i32
    return %c0_i32, %arg1 : i32, i32
  }
  func.func @transform_3(%arg0: i32, %arg1: i32) -> (i32, i32) {
    %c0_i32 = arith.constant 0 : i32
    return %arg0, %arg1 : i32, i32
  }
}

module attributes {stable_mosaic.version = 11 : i64} {
  func.func @_rmsnorm_kernel(%arg0: i32, %arg1: memref<16x32xbf16, #tpu.memory_space<vmem>>, %arg2: memref<1x32xf32, #tpu.memory_space<vmem>>, %arg3: memref<16x32xbf16, #tpu.memory_space<vmem>>) attributes {dimension_semantics = [#tpu.dimension_semantics<parallel>], iteration_bounds = array<i64: 1>, scalar_prefetch = 0 : i64, scratch_operands = 0 : i64, tpu.core_type = #tpu.core_type<tc>, window_params = [{transform_indices = @transform_0, window_bounds = array<i64: 16, 32>}, {pipeline_mode = #tpu.pipeline_mode<synchronous>, transform_indices = @transform_1, window_bounds = array<i64: 1, 32>}, {transform_indices = @transform_2, window_bounds = array<i64: 16, 32>}]} {
    %c0 = arith.constant 0 : index
    %c0_0 = arith.constant 0 : index
    %0 = vector.load %arg1[%c0, %c0_0] : memref<16x32xbf16, #tpu.memory_space<vmem>>, vector<16x32xbf16>
    %1 = arith.extf %0 : vector<16x32xbf16> to vector<16x32xf32>
    %2 = arith.mulf %1, %1 : vector<16x32xf32>
    %cst = arith.constant dense<0.000000e+00> : vector<16xf32>
    %3 = vector.multi_reduction <add>, %2, %cst [1] : vector<16x32xf32> to vector<16xf32>
    %4 = vector.shape_cast %3 : vector<16xf32> to vector<16x1xf32>
    %cst_1 = arith.constant 3.200000e+01 : f32
    %5 = vector.broadcast %cst_1 : f32 to vector<16x1xf32>
    %6 = arith.divf %4, %5 : vector<16x1xf32>
    %cst_2 = arith.constant 9.99999997E-7 : f32
    %7 = vector.broadcast %cst_2 : f32 to vector<16x1xf32>
    %8 = arith.addf %6, %7 : vector<16x1xf32>
    %9 = math.rsqrt %8 : vector<16x1xf32>
    %10 = vector.broadcast %9 : vector<16x1xf32> to vector<16x32xf32>
    %11 = arith.mulf %1, %10 : vector<16x32xf32>
    %c0_3 = arith.constant 0 : index
    %c0_4 = arith.constant 0 : index
    %12 = vector.load %arg2[%c0_3, %c0_4] : memref<1x32xf32, #tpu.memory_space<vmem>>, vector<1x32xf32>
    %13 = vector.broadcast %12 : vector<1x32xf32> to vector<16x32xf32>
    %14 = arith.mulf %11, %13 : vector<16x32xf32>
    %15 = arith.truncf %14 : vector<16x32xf32> to vector<16x32xbf16>
    %c0_5 = arith.constant 0 : index
    %c0_6 = arith.constant 0 : index
    %16 = vector.load %arg3[%c0_5, %c0_6] : memref<16x32xbf16, #tpu.memory_space<vmem>>, vector<16x32xbf16>
    tpu.vector_store %arg3[%c0_5, %c0_6], %15 {strides = array<i32>} : memref<16x32xbf16, #tpu.memory_space<vmem>>, vector<16x32xbf16>,
    return
  }
  func.func @transform_0(%arg0: i32) -> (i32, i32) {
    %c0_i32 = arith.constant 0 : i32
    %c0_i32_0 = arith.constant 0 : i32
    return %arg0, %c0_i32 : i32, i32
  }
  func.func @transform_1(%arg0: i32) -> (i32, i32) {
    %c0_i32 = arith.constant 0 : i32
    %c0_i32_0 = arith.constant 0 : i32
    %c0_i32_1 = arith.constant 0 : i32
    return %c0_i32, %c0_i32_0 : i32, i32
  }
  func.func @transform_2(%arg0: i32) -> (i32, i32) {
    %c0_i32 = arith.constant 0 : i32
    %c0_i32_0 = arith.constant 0 : i32
    return %arg0, %c0_i32 : i32, i32
  }
}

module attributes {stable_mosaic.version = 11 : i64} {
  func.func @_out_proj_kernel(%arg0: i32, %arg1: i32, %arg2: i32, %arg3: memref<1x8x8xbf16, #tpu.memory_space<vmem>>, %arg4: memref<8x32xbf16, #tpu.memory_space<vmem>>, %arg5: memref<1x8x32xbf16, #tpu.memory_space<vmem>>, %arg6: memref<1x8x32xbf16, #tpu.memory_space<vmem>>, %arg7: memref<8x32xf32, #tpu.memory_space<vmem>>) attributes {dimension_semantics = [#tpu.dimension_semantics<parallel>, #tpu.dimension_semantics<parallel>, #tpu.dimension_semantics<arbitrary>], iteration_bounds = array<i64: 2, 1, 4>, scalar_prefetch = 0 : i64, scratch_operands = 1 : i64, tpu.core_type = #tpu.core_type<tc>, window_params = [{transform_indices = @transform_0, window_bounds = array<i64: 1, 8, 8>}, {transform_indices = @transform_1, window_bounds = array<i64: 8, 32>}, {transform_indices = @transform_2, window_bounds = array<i64: 1, 8, 32>}, {transform_indices = @transform_3, window_bounds = array<i64: 1, 8, 32>}]} {
    %c0_i32 = arith.constant 0 : i32
    %0 = arith.cmpi eq, %arg2, %c0_i32 : i32
    %1 = arith.extui %0 : i1 to i32
    %c0_i32_0 = arith.constant 0 : i32
    %2 = arith.cmpi ne, %1, %c0_i32_0 : i32
    scf.if %2 {
      %cst_10 = arith.constant 0.000000e+00 : f32
      %13 = vector.broadcast %cst_10 : f32 to vector<8x32xf32>
      %c0_11 = arith.constant 0 : index
      %c0_12 = arith.constant 0 : index
      %14 = vector.load %arg7[%c0_11, %c0_12] : memref<8x32xf32, #tpu.memory_space<vmem>>, vector<8x32xf32>
      tpu.vector_store %arg7[%c0_11, %c0_12], %13 {strides = array<i32>} : memref<8x32xf32, #tpu.memory_space<vmem>>, vector<8x32xf32>,
    } else {
    }
    %c0 = arith.constant 0 : index
    %c0_1 = arith.constant 0 : index
    %3 = vector.load %arg7[%c0, %c0_1] : memref<8x32xf32, #tpu.memory_space<vmem>>, vector<8x32xf32>
    %c0_2 = arith.constant 0 : index
    %c0_3 = arith.constant 0 : index
    %c0_4 = arith.constant 0 : index
    %4 = vector.load %arg3[%c0_2, %c0_3, %c0_4] : memref<1x8x8xbf16, #tpu.memory_space<vmem>>, vector<1x8x8xbf16>
    %5 = vector.shape_cast %4 : vector<1x8x8xbf16> to vector<8x8xbf16>
    %c0_5 = arith.constant 0 : index
    %c0_6 = arith.constant 0 : index
    %6 = vector.load %arg4[%c0_5, %c0_6] : memref<8x32xbf16, #tpu.memory_space<vmem>>, vector<8x32xbf16>
    %cst = arith.constant dense<0.000000e+00> : vector<8x32xf32>
    %7 = tpu.matmul %5, %6, %cst {dimension_numbers = #tpu.dot_dimension_numbers<[1], [0], [0], [1], [0, 0, 1, 1], [], []>} : vector<8x8xbf16>, vector<8x32xbf16>, vector<8x32xf32> -> vector<8x32xf32>
    %8 = arith.addf %3, %7 : vector<8x32xf32>
    %c0_7 = arith.constant 0 : index
    %c0_8 = arith.constant 0 : index
    %9 = vector.load %arg7[%c0_7, %c0_8] : memref<8x32xf32, #tpu.memory_space<vmem>>, vector<8x32xf32>
    tpu.vector_store %arg7[%c0_7, %c0_8], %8 {strides = array<i32>} : memref<8x32xf32, #tpu.memory_space<vmem>>, vector<8x32xf32>,
    %c3_i32 = arith.constant 3 : i32
    %10 = arith.cmpi eq, %arg2, %c3_i32 : i32
    %11 = arith.extui %10 : i1 to i32
    %c0_i32_9 = arith.constant 0 : i32
    %12 = arith.cmpi ne, %11, %c0_i32_9 : i32
    scf.if %12 {
      %c0_10 = arith.constant 0 : index
      %c0_11 = arith.constant 0 : index
      %13 = vector.load %arg7[%c0_10, %c0_11] : memref<8x32xf32, #tpu.memory_space<vmem>>, vector<8x32xf32>
      %c0_12 = arith.constant 0 : index
      %c0_13 = arith.constant 0 : index
      %c0_14 = arith.constant 0 : index
      %14 = vector.load %arg5[%c0_12, %c0_13, %c0_14] : memref<1x8x32xbf16, #tpu.memory_space<vmem>>, vector<1x8x32xbf16>
      %15 = vector.shape_cast %14 : vector<1x8x32xbf16> to vector<8x32xbf16>
      %16 = arith.extf %15 : vector<8x32xbf16> to vector<8x32xf32>
      %17 = arith.addf %13, %16 : vector<8x32xf32>
      %18 = arith.truncf %17 : vector<8x32xf32> to vector<8x32xbf16>
      %c0_15 = arith.constant 0 : index
      %c0_16 = arith.constant 0 : index
      %c0_17 = arith.constant 0 : index
      %19 = vector.load %arg6[%c0_15, %c0_16, %c0_17] : memref<1x8x32xbf16, #tpu.memory_space<vmem>>, vector<1x8x32xbf16>
      %20 = vector.shape_cast %19 : vector<1x8x32xbf16> to vector<8x32xbf16>
      %21 = vector.shape_cast %18 : vector<8x32xbf16> to vector<1x8x32xbf16>
      tpu.vector_store %arg6[%c0_15, %c0_16, %c0_17], %21 {strides = array<i32>} : memref<1x8x32xbf16, #tpu.memory_space<vmem>>, vector<1x8x32xbf16>,
    } else {
    }
    return
  }
  func.func @transform_0(%arg0: i32, %arg1: i32, %arg2: i32) -> (i32, i32, i32) {
    %c4_i32 = arith.constant 4 : i32
    %0 = arith.muli %arg0, %c4_i32 : i32
    %1 = arith.addi %0, %arg2 : i32
    %c0_i32 = arith.constant 0 : i32
    %c0_i32_0 = arith.constant 0 : i32
    %c0_i32_1 = arith.constant 0 : i32
    return %1, %c0_i32, %c0_i32_0 : i32, i32, i32
  }
  func.func @transform_1(%arg0: i32, %arg1: i32, %arg2: i32) -> (i32, i32) {
    %c0_i32 = arith.constant 0 : i32
    return %arg2, %arg1 : i32, i32
  }
  func.func @transform_2(%arg0: i32, %arg1: i32, %arg2: i32) -> (i32, i32, i32) {
    %c0_i32 = arith.constant 0 : i32
    %c0_i32_0 = arith.constant 0 : i32
    return %arg0, %c0_i32, %arg1 : i32, i32, i32
  }
  func.func @transform_3(%arg0: i32, %arg1: i32, %arg2: i32) -> (i32, i32, i32) {
    %c0_i32 = arith.constant 0 : i32
    %c0_i32_0 = arith.constant 0 : i32
    return %arg0, %c0_i32, %arg1 : i32, i32, i32
  }
}

module attributes {stable_mosaic.version = 11 : i64} {
  func.func @_flash_attn_kernel(%arg0: i32, %arg1: i32, %arg2: memref<2x8x8xbf16, #tpu.memory_space<vmem>>, %arg3: memref<1x8x8xbf16, #tpu.memory_space<vmem>>, %arg4: memref<1x8x8xbf16, #tpu.memory_space<vmem>>, %arg5: memref<8x8xf32, #tpu.memory_space<vmem>>, %arg6: memref<8x8xf32, #tpu.memory_space<vmem>>, %arg7: memref<8x8xf32, #tpu.memory_space<vmem>>, %arg8: memref<8x8xf32, #tpu.memory_space<vmem>>, %arg9: memref<2x8x8xbf16, #tpu.memory_space<vmem>>, %arg10: memref<16x1xf32, #tpu.memory_space<vmem>>, %arg11: memref<16x1xf32, #tpu.memory_space<vmem>>, %arg12: memref<16x8xf32, #tpu.memory_space<vmem>>) attributes {dimension_semantics = [#tpu.dimension_semantics<parallel>, #tpu.dimension_semantics<arbitrary>], iteration_bounds = array<i64: 4, 1>, scalar_prefetch = 0 : i64, scratch_operands = 3 : i64, tpu.core_type = #tpu.core_type<tc>, window_params = [{transform_indices = @transform_0, window_bounds = array<i64: 2, 8, 8>}, {transform_indices = @transform_1, window_bounds = array<i64: 1, 8, 8>}, {transform_indices = @transform_2, window_bounds = array<i64: 1, 8, 8>}, {pipeline_mode = #tpu.pipeline_mode<synchronous>, transform_indices = @transform_3, window_bounds = array<i64: 8, 8>}, {pipeline_mode = #tpu.pipeline_mode<synchronous>, transform_indices = @transform_4, window_bounds = array<i64: 8, 8>}, {transform_indices = @transform_5, window_bounds = array<i64: 8, 8>}, {transform_indices = @transform_6, window_bounds = array<i64: 8, 8>}, {transform_indices = @transform_7, window_bounds = array<i64: 2, 8, 8>}]} {
    %c0_i32 = arith.constant 0 : i32
    %0 = arith.cmpi eq, %arg1, %c0_i32 : i32
    %1 = arith.extui %0 : i1 to i32
    %c0_i32_0 = arith.constant 0 : i32
    %2 = arith.cmpi ne, %1, %c0_i32_0 : i32
    scf.if %2 {
      %cst_50 = arith.constant -1.000000e+30 : f32
      %107 = vector.broadcast %cst_50 : f32 to vector<16x1xf32>
      %c0_51 = arith.constant 0 : index
      %c0_52 = arith.constant 0 : index
      %108 = vector.load %arg10[%c0_51, %c0_52] : memref<16x1xf32, #tpu.memory_space<vmem>>, vector<16x1xf32>
      tpu.vector_store %arg10[%c0_51, %c0_52], %107 {strides = array<i32>} : memref<16x1xf32, #tpu.memory_space<vmem>>, vector<16x1xf32>,
      %cst_53 = arith.constant 0.000000e+00 : f32
      %109 = vector.broadcast %cst_53 : f32 to vector<16x1xf32>
      %c0_54 = arith.constant 0 : index
      %c0_55 = arith.constant 0 : index
      %110 = vector.load %arg11[%c0_54, %c0_55] : memref<16x1xf32, #tpu.memory_space<vmem>>, vector<16x1xf32>
      tpu.vector_store %arg11[%c0_54, %c0_55], %109 {strides = array<i32>} : memref<16x1xf32, #tpu.memory_space<vmem>>, vector<16x1xf32>,
      %cst_56 = arith.constant 0.000000e+00 : f32
      %111 = vector.broadcast %cst_56 : f32 to vector<16x8xf32>
      %c0_57 = arith.constant 0 : index
      %c0_58 = arith.constant 0 : index
      %112 = vector.load %arg12[%c0_57, %c0_58] : memref<16x8xf32, #tpu.memory_space<vmem>>, vector<16x8xf32>
      tpu.vector_store %arg12[%c0_57, %c0_58], %111 {strides = array<i32>} : memref<16x8xf32, #tpu.memory_space<vmem>>, vector<16x8xf32>,
    } else {
    }
    %c0 = arith.constant 0 : index
    %c0_1 = arith.constant 0 : index
    %c0_2 = arith.constant 0 : index
    %3 = vector.load %arg2[%c0, %c0_1, %c0_2] : memref<2x8x8xbf16, #tpu.memory_space<vmem>>, vector<2x8x8xbf16>
    %4 = vector.shape_cast %3 : vector<2x8x8xbf16> to vector<16x8xbf16>
    %c0_3 = arith.constant 0 : index
    %c0_4 = arith.constant 0 : index
    %c0_5 = arith.constant 0 : index
    %5 = vector.load %arg3[%c0_3, %c0_4, %c0_5] : memref<1x8x8xbf16, #tpu.memory_space<vmem>>, vector<1x8x8xbf16>
    %6 = vector.shape_cast %5 : vector<1x8x8xbf16> to vector<8x8xbf16>
    %c0_6 = arith.constant 0 : index
    %c0_7 = arith.constant 0 : index
    %c0_8 = arith.constant 0 : index
    %7 = vector.load %arg4[%c0_6, %c0_7, %c0_8] : memref<1x8x8xbf16, #tpu.memory_space<vmem>>, vector<1x8x8xbf16>
    %8 = vector.shape_cast %7 : vector<1x8x8xbf16> to vector<8x8xbf16>
    %9 = tpu.iota {dimensions = array<i32: 0>} : vector<8x8xi32>
    %10 = tpu.iota {dimensions = array<i32: 1>} : vector<8x8xi32>
    %c1_i32 = arith.constant 1 : i32
    %11 = vector.broadcast %c1_i32 : i32 to vector<8x8xi32>
    %12 = arith.addi %9, %11 : vector<8x8xi32>
    %c2_i32 = arith.constant 2 : i32
    %c0_i32_9 = arith.constant 0 : i32
    %13 = arith.cmpi eq, %c2_i32, %c0_i32_9 : i32
    %c1_i32_10 = arith.constant 1 : i32
    %14 = arith.select %13, %c1_i32_10, %c2_i32 : i32
    %15 = vector.broadcast %14 : i32 to vector<8x8xi32>
    %16 = arith.remsi %9, %15 : vector<8x8xi32>
    %c0_i32_11 = arith.constant 0 : i32
    %17 = vector.broadcast %c0_i32_11 : i32 to vector<8x8xi32>
    %18 = arith.cmpi ne, %16, %17 : vector<8x8xi32>
    %c0_i32_12 = arith.constant 0 : i32
    %19 = vector.broadcast %c0_i32_12 : i32 to vector<8x8xi32>
    %20 = arith.cmpi slt, %16, %19 : vector<8x8xi32>
    %c0_i32_13 = arith.constant 0 : i32
    %21 = arith.cmpi slt, %14, %c0_i32_13 : i32
    %22 = vector.broadcast %21 : i1 to vector<8x8xi1>
    %23 = vector.broadcast %22 : vector<8x8xi1> to vector<8x8xi1>
    %24 = arith.xori %20, %23 : vector<8x8xi1>
    %25 = arith.andi %24, %18 : vector<8x8xi1>
    %26 = vector.broadcast %14 : i32 to vector<8x8xi32>
    %27 = arith.addi %16, %26 : vector<8x8xi32>
    %28 = arith.select %25, %27, %16 : vector<8x8xi1>, vector<8x8xi32>
    %c2_i32_14 = arith.constant 2 : i32
    %29 = vector.broadcast %c2_i32_14 : i32 to vector<8x8xi32>
    %30 = arith.muli %29, %28 : vector<8x8xi32>
    %31 = arith.subi %12, %30 : vector<8x8xi32>
    %32 = arith.cmpi eq, %10, %31 : vector<8x8xi32>
    %33 = arith.extui %32 : vector<8x8xi1> to vector<8x8xi32>
    %34 = arith.sitofp %33 : vector<8x8xi32> to vector<8x8xf32>
    %35 = arith.extf %4 : vector<16x8xbf16> to vector<16x8xf32>
    %36 = arith.extf %6 : vector<8x8xbf16> to vector<8x8xf32>
    %c0_15 = arith.constant 0 : index
    %c0_16 = arith.constant 0 : index
    %37 = vector.load %arg5[%c0_15, %c0_16] : memref<8x8xf32, #tpu.memory_space<vmem>>, vector<8x8xf32>
    %38 = tpu.concatenate %37, %37 in 0 : vector<8x8xf32>, vector<8x8xf32> -> vector<16x8xf32>
    %c0_17 = arith.constant 0 : index
    %c0_18 = arith.constant 0 : index
    %39 = vector.load %arg6[%c0_17, %c0_18] : memref<8x8xf32, #tpu.memory_space<vmem>>, vector<8x8xf32>
    %40 = tpu.concatenate %39, %39 in 0 : vector<8x8xf32>, vector<8x8xf32> -> vector<16x8xf32>
    %41 = arith.mulf %35, %38 : vector<16x8xf32>
    %cst = arith.constant dense<0.000000e+00> : vector<16x8xf32>
    %42 = tpu.matmul %35, %34, %cst {dimension_numbers = #tpu.dot_dimension_numbers<[1], [0], [0], [1], [0, 0, 1, 1], [], []>} : vector<16x8xf32>, vector<8x8xf32>, vector<16x8xf32> -> vector<16x8xf32>
    %43 = arith.mulf %42, %40 : vector<16x8xf32>
    %44 = arith.addf %41, %43 : vector<16x8xf32>
    %c0_19 = arith.constant 0 : index
    %c0_20 = arith.constant 0 : index
    %45 = vector.load %arg7[%c0_19, %c0_20] : memref<8x8xf32, #tpu.memory_space<vmem>>, vector<8x8xf32>
    %46 = arith.mulf %36, %45 : vector<8x8xf32>
    %cst_21 = arith.constant dense<0.000000e+00> : vector<8x8xf32>
    %47 = tpu.matmul %36, %34, %cst_21 {dimension_numbers = #tpu.dot_dimension_numbers<[1], [0], [0], [1], [0, 0, 1, 1], [], []>} : vector<8x8xf32>, vector<8x8xf32>, vector<8x8xf32> -> vector<8x8xf32>
    %c0_22 = arith.constant 0 : index
    %c0_23 = arith.constant 0 : index
    %48 = vector.load %arg8[%c0_22, %c0_23] : memref<8x8xf32, #tpu.memory_space<vmem>>, vector<8x8xf32>
    %49 = arith.mulf %47, %48 : vector<8x8xf32>
    %50 = arith.addf %46, %49 : vector<8x8xf32>
    %51 = arith.truncf %44 : vector<16x8xf32> to vector<16x8xbf16>
    %52 = arith.truncf %50 : vector<8x8xf32> to vector<8x8xbf16>
    %53 = tpu.transpose %52, [1, 0] : vector<8x8xbf16> -> vector<8x8xbf16>
    %cst_24 = arith.constant dense<0.000000e+00> : vector<16x8xf32>
    %54 = tpu.matmul %51, %53, %cst_24 {dimension_numbers = #tpu.dot_dimension_numbers<[1], [0], [0], [1], [0, 0, 1, 1], [], []>} : vector<16x8xbf16>, vector<8x8xbf16>, vector<16x8xf32> -> vector<16x8xf32>
    %cst_25 = arith.constant 0.353553385 : f32
    %55 = vector.broadcast %cst_25 : f32 to vector<16x8xf32>
    %56 = arith.mulf %54, %55 : vector<16x8xf32>
    %57 = tpu.iota {dimensions = array<i32: 0>} : vector<16x8xi32>
    %c8_i32 = arith.constant 8 : i32
    %c0_i32_26 = arith.constant 0 : i32
    %58 = arith.cmpi eq, %c8_i32, %c0_i32_26 : i32
    %c1_i32_27 = arith.constant 1 : i32
    %59 = arith.select %58, %c1_i32_27, %c8_i32 : i32
    %60 = vector.broadcast %59 : i32 to vector<16x8xi32>
    %61 = arith.remsi %57, %60 : vector<16x8xi32>
    %c0_i32_28 = arith.constant 0 : i32
    %62 = vector.broadcast %c0_i32_28 : i32 to vector<16x8xi32>
    %63 = arith.cmpi ne, %61, %62 : vector<16x8xi32>
    %c0_i32_29 = arith.constant 0 : i32
    %64 = vector.broadcast %c0_i32_29 : i32 to vector<16x8xi32>
    %65 = arith.cmpi slt, %61, %64 : vector<16x8xi32>
    %c0_i32_30 = arith.constant 0 : i32
    %66 = arith.cmpi slt, %59, %c0_i32_30 : i32
    %67 = vector.broadcast %66 : i1 to vector<16x8xi1>
    %68 = vector.broadcast %67 : vector<16x8xi1> to vector<16x8xi1>
    %69 = arith.xori %65, %68 : vector<16x8xi1>
    %70 = arith.andi %69, %63 : vector<16x8xi1>
    %71 = vector.broadcast %59 : i32 to vector<16x8xi32>
    %72 = arith.addi %61, %71 : vector<16x8xi32>
    %73 = arith.select %70, %72, %61 : vector<16x8xi1>, vector<16x8xi32>
    %74 = tpu.iota {dimensions = array<i32: 1>} : vector<16x8xi32>
    %c8_i32_31 = arith.constant 8 : i32
    %75 = arith.muli %arg1, %c8_i32_31 : i32
    %76 = vector.broadcast %75 : i32 to vector<16x8xi32>
    %77 = arith.addi %74, %76 : vector<16x8xi32>
    %78 = arith.cmpi sle, %77, %73 : vector<16x8xi32>
    %cst_32 = arith.constant -1.000000e+30 : f32
    %79 = vector.broadcast %cst_32 : f32 to vector<16x8xf32>
    %80 = arith.select %78, %56, %79 : vector<16x8xi1>, vector<16x8xf32>
    %c0_33 = arith.constant 0 : index
    %c0_34 = arith.constant 0 : index
    %81 = vector.load %arg10[%c0_33, %c0_34] : memref<16x1xf32, #tpu.memory_space<vmem>>, vector<16x1xf32>
    %cst_35 = arith.constant dense<0xFF800000> : vector<16xf32>
    %82 = vector.multi_reduction <maximumf>, %80, %cst_35 [1] : vector<16x8xf32> to vector<16xf32>
    %83 = vector.shape_cast %82 : vector<16xf32> to vector<16x1xf32>
    %84 = arith.maximumf %81, %83 : vector<16x1xf32>
    %85 = arith.subf %81, %84 : vector<16x1xf32>
    %86 = math.exp %85 : vector<16x1xf32>
    %87 = vector.broadcast %84 : vector<16x1xf32> to vector<16x8xf32>
    %88 = arith.subf %80, %87 : vector<16x8xf32>
    %89 = math.exp %88 : vector<16x8xf32>
    %c0_36 = arith.constant 0 : index
    %c0_37 = arith.constant 0 : index
    %90 = vector.load %arg11[%c0_36, %c0_37] : memref<16x1xf32, #tpu.memory_space<vmem>>, vector<16x1xf32>
    %91 = arith.mulf %86, %90 : vector<16x1xf32>
    %cst_38 = arith.constant dense<0.000000e+00> : vector<16xf32>
    %92 = vector.multi_reduction <add>, %89, %cst_38 [1] : vector<16x8xf32> to vector<16xf32>
    %93 = vector.shape_cast %92 : vector<16xf32> to vector<16x1xf32>
    %94 = arith.addf %91, %93 : vector<16x1xf32>
    %c0_39 = arith.constant 0 : index
    %c0_40 = arith.constant 0 : index
    %95 = vector.load %arg11[%c0_39, %c0_40] : memref<16x1xf32, #tpu.memory_space<vmem>>, vector<16x1xf32>
    tpu.vector_store %arg11[%c0_39, %c0_40], %94 {strides = array<i32>} : memref<16x1xf32, #tpu.memory_space<vmem>>, vector<16x1xf32>,
    %c0_41 = arith.constant 0 : index
    %c0_42 = arith.constant 0 : index
    %96 = vector.load %arg12[%c0_41, %c0_42] : memref<16x8xf32, #tpu.memory_space<vmem>>, vector<16x8xf32>
    %97 = vector.broadcast %86 : vector<16x1xf32> to vector<16x8xf32>
    %98 = arith.mulf %97, %96 : vector<16x8xf32>
    %99 = arith.truncf %89 : vector<16x8xf32> to vector<16x8xbf16>
    %cst_43 = arith.constant dense<0.000000e+00> : vector<16x8xf32>
    %100 = tpu.matmul %99, %8, %cst_43 {dimension_numbers = #tpu.dot_dimension_numbers<[1], [0], [0], [1], [0, 0, 1, 1], [], []>} : vector<16x8xbf16>, vector<8x8xbf16>, vector<16x8xf32> -> vector<16x8xf32>
    %101 = arith.addf %98, %100 : vector<16x8xf32>
    %c0_44 = arith.constant 0 : index
    %c0_45 = arith.constant 0 : index
    %102 = vector.load %arg12[%c0_44, %c0_45] : memref<16x8xf32, #tpu.memory_space<vmem>>, vector<16x8xf32>
    tpu.vector_store %arg12[%c0_44, %c0_45], %101 {strides = array<i32>} : memref<16x8xf32, #tpu.memory_space<vmem>>, vector<16x8xf32>,
    %c0_46 = arith.constant 0 : index
    %c0_47 = arith.constant 0 : index
    %103 = vector.load %arg10[%c0_46, %c0_47] : memref<16x1xf32, #tpu.memory_space<vmem>>, vector<16x1xf32>
    tpu.vector_store %arg10[%c0_46, %c0_47], %84 {strides = array<i32>} : memref<16x1xf32, #tpu.memory_space<vmem>>, vector<16x1xf32>,
    %c0_i32_48 = arith.constant 0 : i32
    %104 = arith.cmpi eq, %arg1, %c0_i32_48 : i32
    %105 = arith.extui %104 : i1 to i32
    %c0_i32_49 = arith.constant 0 : i32
    %106 = arith.cmpi ne, %105, %c0_i32_49 : i32
    scf.if %106 {
      %c0_50 = arith.constant 0 : index
      %c0_51 = arith.constant 0 : index
      %107 = vector.load %arg11[%c0_50, %c0_51] : memref<16x1xf32, #tpu.memory_space<vmem>>, vector<16x1xf32>
      %108 = tpu.reciprocal %107 {approx = true} : vector<16x1xf32> -> vector<16x1xf32>
      %c0_52 = arith.constant 0 : index
      %c0_53 = arith.constant 0 : index
      %109 = vector.load %arg12[%c0_52, %c0_53] : memref<16x8xf32, #tpu.memory_space<vmem>>, vector<16x8xf32>
      %110 = vector.broadcast %108 : vector<16x1xf32> to vector<16x8xf32>
      %111 = arith.mulf %109, %110 : vector<16x8xf32>
      %112 = vector.shape_cast %111 : vector<16x8xf32> to vector<2x8x8xf32>
      %113 = arith.truncf %112 : vector<2x8x8xf32> to vector<2x8x8xbf16>
      %c0_54 = arith.constant 0 : index
      %c0_55 = arith.constant 0 : index
      %c0_56 = arith.constant 0 : index
      %114 = vector.load %arg9[%c0_54, %c0_55, %c0_56] : memref<2x8x8xbf16, #tpu.memory_space<vmem>>, vector<2x8x8xbf16>
      tpu.vector_store %arg9[%c0_54, %c0_55, %c0_56], %113 {strides = array<i32>} : memref<2x8x8xbf16, #tpu.memory_space<vmem>>, vector<2x8x8xbf16>,
    } else {
    }
    return
  }
  func.func @transform_0(%arg0: i32, %arg1: i32) -> (i32, i32, i32) {
    %c0_i32 = arith.constant 0 : i32
    %c0_i32_0 = arith.constant 0 : i32
    %c0_i32_1 = arith.constant 0 : i32
    return %arg0, %c0_i32, %c0_i32_0 : i32, i32, i32
  }
  func.func @transform_1(%arg0: i32, %arg1: i32) -> (i32, i32, i32) {
    %c0_i32 = arith.constant 0 : i32
    %c0_i32_0 = arith.constant 0 : i32
    return %arg0, %arg1, %c0_i32 : i32, i32, i32
  }
  func.func @transform_2(%arg0: i32, %arg1: i32) -> (i32, i32, i32) {
    %c0_i32 = arith.constant 0 : i32
    %c0_i32_0 = arith.constant 0 : i32
    return %arg0, %arg1, %c0_i32 : i32, i32, i32
  }
  func.func @transform_3(%arg0: i32, %arg1: i32) -> (i32, i32) {
    %c0_i32 = arith.constant 0 : i32
    %c0_i32_0 = arith.constant 0 : i32
    %c0_i32_1 = arith.constant 0 : i32
    return %c0_i32, %c0_i32_0 : i32, i32
  }
  func.func @transform_4(%arg0: i32, %arg1: i32) -> (i32, i32) {
    %c0_i32 = arith.constant 0 : i32
    %c0_i32_0 = arith.constant 0 : i32
    %c0_i32_1 = arith.constant 0 : i32
    return %c0_i32, %c0_i32_0 : i32, i32
  }
  func.func @transform_5(%arg0: i32, %arg1: i32) -> (i32, i32) {
    %c0_i32 = arith.constant 0 : i32
    %c0_i32_0 = arith.constant 0 : i32
    return %arg1, %c0_i32 : i32, i32
  }
  func.func @transform_6(%arg0: i32, %arg1: i32) -> (i32, i32) {
    %c0_i32 = arith.constant 0 : i32
    %c0_i32_0 = arith.constant 0 : i32
    return %arg1, %c0_i32 : i32, i32
  }
  func.func @transform_7(%arg0: i32, %arg1: i32) -> (i32, i32, i32) {
    %c0_i32 = arith.constant 0 : i32
    %c0_i32_0 = arith.constant 0 : i32
    %c0_i32_1 = arith.constant 0 : i32
    return %arg0, %c0_i32, %c0_i32_0 : i32, i32, i32
  }
}

module attributes {stable_mosaic.version = 11 : i64} {
  func.func @_norm_matmul_kernel(%arg0: i32, %arg1: i32, %arg2: memref<16x32xbf16, #tpu.memory_space<vmem>>, %arg3: memref<1x32xf32, #tpu.memory_space<vmem>>, %arg4: memref<32x32xbf16, #tpu.memory_space<vmem>>, %arg5: memref<16x32xbf16, #tpu.memory_space<vmem>>) attributes {dimension_semantics = [#tpu.dimension_semantics<parallel>, #tpu.dimension_semantics<parallel>], iteration_bounds = array<i64: 1, 1>, scalar_prefetch = 0 : i64, scratch_operands = 0 : i64, tpu.core_type = #tpu.core_type<tc>, window_params = [{transform_indices = @transform_0, window_bounds = array<i64: 16, 32>}, {pipeline_mode = #tpu.pipeline_mode<synchronous>, transform_indices = @transform_1, window_bounds = array<i64: 1, 32>}, {transform_indices = @transform_2, window_bounds = array<i64: 32, 32>}, {transform_indices = @transform_3, window_bounds = array<i64: 16, 32>}]} {
    %c0 = arith.constant 0 : index
    %c0_0 = arith.constant 0 : index
    %0 = vector.load %arg2[%c0, %c0_0] : memref<16x32xbf16, #tpu.memory_space<vmem>>, vector<16x32xbf16>
    %1 = arith.extf %0 : vector<16x32xbf16> to vector<16x32xf32>
    %2 = arith.mulf %1, %1 : vector<16x32xf32>
    %cst = arith.constant dense<0.000000e+00> : vector<16xf32>
    %3 = vector.multi_reduction <add>, %2, %cst [1] : vector<16x32xf32> to vector<16xf32>
    %4 = vector.shape_cast %3 : vector<16xf32> to vector<16x1xf32>
    %cst_1 = arith.constant 3.200000e+01 : f32
    %5 = vector.broadcast %cst_1 : f32 to vector<16x1xf32>
    %6 = arith.divf %4, %5 : vector<16x1xf32>
    %cst_2 = arith.constant 9.99999997E-7 : f32
    %7 = vector.broadcast %cst_2 : f32 to vector<16x1xf32>
    %8 = arith.addf %6, %7 : vector<16x1xf32>
    %9 = math.rsqrt %8 : vector<16x1xf32>
    %10 = vector.broadcast %9 : vector<16x1xf32> to vector<16x32xf32>
    %11 = arith.mulf %1, %10 : vector<16x32xf32>
    %c0_3 = arith.constant 0 : index
    %c0_4 = arith.constant 0 : index
    %12 = vector.load %arg3[%c0_3, %c0_4] : memref<1x32xf32, #tpu.memory_space<vmem>>, vector<1x32xf32>
    %13 = vector.broadcast %12 : vector<1x32xf32> to vector<16x32xf32>
    %14 = arith.mulf %11, %13 : vector<16x32xf32>
    %15 = arith.truncf %14 : vector<16x32xf32> to vector<16x32xbf16>
    %c0_5 = arith.constant 0 : index
    %c0_6 = arith.constant 0 : index
    %16 = vector.load %arg4[%c0_5, %c0_6] : memref<32x32xbf16, #tpu.memory_space<vmem>>, vector<32x32xbf16>
    %cst_7 = arith.constant dense<0.000000e+00> : vector<16x32xf32>
    %17 = tpu.matmul %15, %16, %cst_7 {dimension_numbers = #tpu.dot_dimension_numbers<[1], [0], [0], [1], [0, 0, 1, 1], [], []>} : vector<16x32xbf16>, vector<32x32xbf16>, vector<16x32xf32> -> vector<16x32xf32>
    %18 = arith.truncf %17 : vector<16x32xf32> to vector<16x32xbf16>
    %c0_8 = arith.constant 0 : index
    %c0_9 = arith.constant 0 : index
    %19 = vector.load %arg5[%c0_8, %c0_9] : memref<16x32xbf16, #tpu.memory_space<vmem>>, vector<16x32xbf16>
    tpu.vector_store %arg5[%c0_8, %c0_9], %18 {strides = array<i32>} : memref<16x32xbf16, #tpu.memory_space<vmem>>, vector<16x32xbf16>,
    return
  }
  func.func @transform_0(%arg0: i32, %arg1: i32) -> (i32, i32) {
    %c0_i32 = arith.constant 0 : i32
    %c0_i32_0 = arith.constant 0 : i32
    return %arg0, %c0_i32 : i32, i32
  }
  func.func @transform_1(%arg0: i32, %arg1: i32) -> (i32, i32) {
    %c0_i32 = arith.constant 0 : i32
    %c0_i32_0 = arith.constant 0 : i32
    %c0_i32_1 = arith.constant 0 : i32
    return %c0_i32, %c0_i32_0 : i32, i32
  }
  func.func @transform_2(%arg0: i32, %arg1: i32) -> (i32, i32) {
    %c0_i32 = arith.constant 0 : i32
    %c0_i32_0 = arith.constant 0 : i32
    return %c0_i32, %arg1 : i32, i32
  }
  func.func @transform_3(%arg0: i32, %arg1: i32) -> (i32, i32) {
    %c0_i32 = arith.constant 0 : i32
    return %arg0, %arg1 : i32, i32
  }
}

module attributes {stable_mosaic.version = 11 : i64} {
  func.func @_ffn_kernel(%arg0: i32, %arg1: i32, %arg2: memref<16x32xbf16, #tpu.memory_space<vmem>>, %arg3: memref<1x32xf32, #tpu.memory_space<vmem>>, %arg4: memref<32x64xbf16, #tpu.memory_space<vmem>>, %arg5: memref<64x32xbf16, #tpu.memory_space<vmem>>, %arg6: memref<16x32xbf16, #tpu.memory_space<vmem>>, %arg7: memref<16x32xbf16, #tpu.memory_space<vmem>>, %arg8: memref<16x32xf32, #tpu.memory_space<vmem>>) attributes {dimension_semantics = [#tpu.dimension_semantics<parallel>, #tpu.dimension_semantics<arbitrary>], iteration_bounds = array<i64: 1, 1>, scalar_prefetch = 0 : i64, scratch_operands = 2 : i64, tpu.core_type = #tpu.core_type<tc>, window_params = [{transform_indices = @transform_0, window_bounds = array<i64: 16, 32>}, {pipeline_mode = #tpu.pipeline_mode<synchronous>, transform_indices = @transform_1, window_bounds = array<i64: 1, 32>}, {transform_indices = @transform_2, window_bounds = array<i64: 32, 64>}, {transform_indices = @transform_3, window_bounds = array<i64: 64, 32>}, {transform_indices = @transform_4, window_bounds = array<i64: 16, 32>}]} {
    %c0_i32 = arith.constant 0 : i32
    %0 = arith.cmpi eq, %arg1, %c0_i32 : i32
    %1 = arith.extui %0 : i1 to i32
    %c0_i32_0 = arith.constant 0 : i32
    %2 = arith.cmpi ne, %1, %c0_i32_0 : i32
    scf.if %2 {
      %c0_14 = arith.constant 0 : index
      %c0_15 = arith.constant 0 : index
      %21 = vector.load %arg2[%c0_14, %c0_15] : memref<16x32xbf16, #tpu.memory_space<vmem>>, vector<16x32xbf16>
      %22 = arith.extf %21 : vector<16x32xbf16> to vector<16x32xf32>
      %23 = arith.mulf %22, %22 : vector<16x32xf32>
      %cst_16 = arith.constant dense<0.000000e+00> : vector<16xf32>
      %24 = vector.multi_reduction <add>, %23, %cst_16 [1] : vector<16x32xf32> to vector<16xf32>
      %25 = vector.shape_cast %24 : vector<16xf32> to vector<16x1xf32>
      %cst_17 = arith.constant 3.200000e+01 : f32
      %26 = vector.broadcast %cst_17 : f32 to vector<16x1xf32>
      %27 = arith.divf %25, %26 : vector<16x1xf32>
      %cst_18 = arith.constant 9.99999997E-7 : f32
      %28 = vector.broadcast %cst_18 : f32 to vector<16x1xf32>
      %29 = arith.addf %27, %28 : vector<16x1xf32>
      %30 = math.rsqrt %29 : vector<16x1xf32>
      %31 = vector.broadcast %30 : vector<16x1xf32> to vector<16x32xf32>
      %32 = arith.mulf %22, %31 : vector<16x32xf32>
      %c0_19 = arith.constant 0 : index
      %c0_20 = arith.constant 0 : index
      %33 = vector.load %arg3[%c0_19, %c0_20] : memref<1x32xf32, #tpu.memory_space<vmem>>, vector<1x32xf32>
      %34 = vector.broadcast %33 : vector<1x32xf32> to vector<16x32xf32>
      %35 = arith.mulf %32, %34 : vector<16x32xf32>
      %36 = arith.truncf %35 : vector<16x32xf32> to vector<16x32xbf16>
      %c0_21 = arith.constant 0 : index
      %c0_22 = arith.constant 0 : index
      %37 = vector.load %arg7[%c0_21, %c0_22] : memref<16x32xbf16, #tpu.memory_space<vmem>>, vector<16x32xbf16>
      tpu.vector_store %arg7[%c0_21, %c0_22], %36 {strides = array<i32>} : memref<16x32xbf16, #tpu.memory_space<vmem>>, vector<16x32xbf16>,
      %cst_23 = arith.constant 0.000000e+00 : f32
      %38 = vector.broadcast %cst_23 : f32 to vector<16x32xf32>
      %c0_24 = arith.constant 0 : index
      %c0_25 = arith.constant 0 : index
      %39 = vector.load %arg8[%c0_24, %c0_25] : memref<16x32xf32, #tpu.memory_space<vmem>>, vector<16x32xf32>
      tpu.vector_store %arg8[%c0_24, %c0_25], %38 {strides = array<i32>} : memref<16x32xf32, #tpu.memory_space<vmem>>, vector<16x32xf32>,
    } else {
    }
    %c0 = arith.constant 0 : index
    %c0_1 = arith.constant 0 : index
    %3 = vector.load %arg7[%c0, %c0_1] : memref<16x32xbf16, #tpu.memory_space<vmem>>, vector<16x32xbf16>
    %c0_2 = arith.constant 0 : index
    %c0_3 = arith.constant 0 : index
    %4 = vector.load %arg4[%c0_2, %c0_3] : memref<32x64xbf16, #tpu.memory_space<vmem>>, vector<32x64xbf16>
    %cst = arith.constant dense<0.000000e+00> : vector<16x64xf32>
    %5 = tpu.matmul %3, %4, %cst {dimension_numbers = #tpu.dot_dimension_numbers<[1], [0], [0], [1], [0, 0, 1, 1], [], []>} : vector<16x32xbf16>, vector<32x64xbf16>, vector<16x64xf32> -> vector<16x64xf32>
    %6 = arith.negf %5 : vector<16x64xf32>
    %7 = math.exp %6 : vector<16x64xf32>
    %cst_4 = arith.constant 1.000000e+00 : f32
    %8 = vector.broadcast %cst_4 : f32 to vector<16x64xf32>
    %9 = arith.addf %8, %7 : vector<16x64xf32>
    %10 = arith.divf %8, %9 : vector<16x64xf32>
    %11 = arith.mulf %5, %10 : vector<16x64xf32>
    %c0_5 = arith.constant 0 : index
    %c0_6 = arith.constant 0 : index
    %12 = vector.load %arg8[%c0_5, %c0_6] : memref<16x32xf32, #tpu.memory_space<vmem>>, vector<16x32xf32>
    %13 = arith.truncf %11 : vector<16x64xf32> to vector<16x64xbf16>
    %c0_7 = arith.constant 0 : index
    %c0_8 = arith.constant 0 : index
    %14 = vector.load %arg5[%c0_7, %c0_8] : memref<64x32xbf16, #tpu.memory_space<vmem>>, vector<64x32xbf16>
    %cst_9 = arith.constant dense<0.000000e+00> : vector<16x32xf32>
    %15 = tpu.matmul %13, %14, %cst_9 {dimension_numbers = #tpu.dot_dimension_numbers<[1], [0], [0], [1], [0, 0, 1, 1], [], []>} : vector<16x64xbf16>, vector<64x32xbf16>, vector<16x32xf32> -> vector<16x32xf32>
    %16 = arith.addf %12, %15 : vector<16x32xf32>
    %c0_10 = arith.constant 0 : index
    %c0_11 = arith.constant 0 : index
    %17 = vector.load %arg8[%c0_10, %c0_11] : memref<16x32xf32, #tpu.memory_space<vmem>>, vector<16x32xf32>
    tpu.vector_store %arg8[%c0_10, %c0_11], %16 {strides = array<i32>} : memref<16x32xf32, #tpu.memory_space<vmem>>, vector<16x32xf32>,
    %c0_i32_12 = arith.constant 0 : i32
    %18 = arith.cmpi eq, %arg1, %c0_i32_12 : i32
    %19 = arith.extui %18 : i1 to i32
    %c0_i32_13 = arith.constant 0 : i32
    %20 = arith.cmpi ne, %19, %c0_i32_13 : i32
    scf.if %20 {
      %c0_14 = arith.constant 0 : index
      %c0_15 = arith.constant 0 : index
      %21 = vector.load %arg8[%c0_14, %c0_15] : memref<16x32xf32, #tpu.memory_space<vmem>>, vector<16x32xf32>
      %c0_16 = arith.constant 0 : index
      %c0_17 = arith.constant 0 : index
      %22 = vector.load %arg2[%c0_16, %c0_17] : memref<16x32xbf16, #tpu.memory_space<vmem>>, vector<16x32xbf16>
      %23 = arith.extf %22 : vector<16x32xbf16> to vector<16x32xf32>
      %24 = arith.addf %21, %23 : vector<16x32xf32>
      %25 = arith.truncf %24 : vector<16x32xf32> to vector<16x32xbf16>
      %c0_18 = arith.constant 0 : index
      %c0_19 = arith.constant 0 : index
      %26 = vector.load %arg6[%c0_18, %c0_19] : memref<16x32xbf16, #tpu.memory_space<vmem>>, vector<16x32xbf16>
      tpu.vector_store %arg6[%c0_18, %c0_19], %25 {strides = array<i32>} : memref<16x32xbf16, #tpu.memory_space<vmem>>, vector<16x32xbf16>,
    } else {
    }
    return
  }
  func.func @transform_0(%arg0: i32, %arg1: i32) -> (i32, i32) {
    %c0_i32 = arith.constant 0 : i32
    %c0_i32_0 = arith.constant 0 : i32
    return %arg0, %c0_i32 : i32, i32
  }
  func.func @transform_1(%arg0: i32, %arg1: i32) -> (i32, i32) {
    %c0_i32 = arith.constant 0 : i32
    %c0_i32_0 = arith.constant 0 : i32
    %c0_i32_1 = arith.constant 0 : i32
    return %c0_i32, %c0_i32_0 : i32, i32
  }
  func.func @transform_2(%arg0: i32, %arg1: i32) -> (i32, i32) {
    %c0_i32 = arith.constant 0 : i32
    %c0_i32_0 = arith.constant 0 : i32
    return %c0_i32, %arg1 : i32, i32
  }
  func.func @transform_3(%arg0: i32, %arg1: i32) -> (i32, i32) {
    %c0_i32 = arith.constant 0 : i32
    %c0_i32_0 = arith.constant 0 : i32
    return %arg1, %c0_i32 : i32, i32
  }
  func.func @transform_4(%arg0: i32, %arg1: i32) -> (i32, i32) {
    %c0_i32 = arith.constant 0 : i32
    %c0_i32_0 = arith.constant 0 : i32
    return %arg0, %c0_i32 : i32, i32
  }
}

module attributes {stable_mosaic.version = 11 : i64} {
  func.func @_matmul_kernel(%arg0: i32, %arg1: i32, %arg2: memref<16x32xbf16, #tpu.memory_space<vmem>>, %arg3: memref<32x32xbf16, #tpu.memory_space<vmem>>, %arg4: memref<16x32xbf16, #tpu.memory_space<vmem>>) attributes {dimension_semantics = [#tpu.dimension_semantics<parallel>, #tpu.dimension_semantics<parallel>], iteration_bounds = array<i64: 1, 1>, scalar_prefetch = 0 : i64, scratch_operands = 0 : i64, tpu.core_type = #tpu.core_type<tc>, window_params = [{transform_indices = @transform_0, window_bounds = array<i64: 16, 32>}, {transform_indices = @transform_1, window_bounds = array<i64: 32, 32>}, {transform_indices = @transform_2, window_bounds = array<i64: 16, 32>}]} {
    %c0 = arith.constant 0 : index
    %c0_0 = arith.constant 0 : index
    %0 = vector.load %arg2[%c0, %c0_0] : memref<16x32xbf16, #tpu.memory_space<vmem>>, vector<16x32xbf16>
    %c0_1 = arith.constant 0 : index
    %c0_2 = arith.constant 0 : index
    %1 = vector.load %arg3[%c0_1, %c0_2] : memref<32x32xbf16, #tpu.memory_space<vmem>>, vector<32x32xbf16>
    %cst = arith.constant dense<0.000000e+00> : vector<16x32xf32>
    %2 = tpu.matmul %0, %1, %cst {dimension_numbers = #tpu.dot_dimension_numbers<[1], [0], [0], [1], [0, 0, 1, 1], [], []>} : vector<16x32xbf16>, vector<32x32xbf16>, vector<16x32xf32> -> vector<16x32xf32>
    %3 = arith.truncf %2 : vector<16x32xf32> to vector<16x32xbf16>
    %c0_3 = arith.constant 0 : index
    %c0_4 = arith.constant 0 : index
    %4 = vector.load %arg4[%c0_3, %c0_4] : memref<16x32xbf16, #tpu.memory_space<vmem>>, vector<16x32xbf16>
    tpu.vector_store %arg4[%c0_3, %c0_4], %3 {strides = array<i32>} : memref<16x32xbf16, #tpu.memory_space<vmem>>, vector<16x32xbf16>,
    return
  }
  func.func @transform_0(%arg0: i32, %arg1: i32) -> (i32, i32) {
    %c0_i32 = arith.constant 0 : i32
    %c0_i32_0 = arith.constant 0 : i32
    return %arg0, %c0_i32 : i32, i32
  }
  func.func @transform_1(%arg0: i32, %arg1: i32) -> (i32, i32) {
    %c0_i32 = arith.constant 0 : i32
    %c0_i32_0 = arith.constant 0 : i32
    return %c0_i32, %arg1 : i32, i32
  }
  func.func @transform_2(%arg0: i32, %arg1: i32) -> (i32, i32) {
    %c0_i32 = arith.constant 0 : i32
    return %arg0, %arg1 : i32, i32
  }
}

module attributes {stable_mosaic.version = 11 : i64} {
  func.func @_flash_attn_kernel(%arg0: i32, %arg1: i32, %arg2: memref<2x8x8xbf16, #tpu.memory_space<vmem>>, %arg3: memref<1x8x8xbf16, #tpu.memory_space<vmem>>, %arg4: memref<1x8x8xbf16, #tpu.memory_space<vmem>>, %arg5: memref<2x8x8xbf16, #tpu.memory_space<vmem>>, %arg6: memref<16x1xf32, #tpu.memory_space<vmem>>, %arg7: memref<16x1xf32, #tpu.memory_space<vmem>>, %arg8: memref<16x8xf32, #tpu.memory_space<vmem>>) attributes {dimension_semantics = [#tpu.dimension_semantics<parallel>, #tpu.dimension_semantics<arbitrary>], iteration_bounds = array<i64: 4, 1>, scalar_prefetch = 0 : i64, scratch_operands = 3 : i64, tpu.core_type = #tpu.core_type<tc>, window_params = [{transform_indices = @transform_0, window_bounds = array<i64: 2, 8, 8>}, {transform_indices = @transform_1, window_bounds = array<i64: 1, 8, 8>}, {transform_indices = @transform_2, window_bounds = array<i64: 1, 8, 8>}, {transform_indices = @transform_3, window_bounds = array<i64: 2, 8, 8>}]} {
    %c0_i32 = arith.constant 0 : i32
    %0 = arith.cmpi eq, %arg1, %c0_i32 : i32
    %1 = arith.extui %0 : i1 to i32
    %c0_i32_0 = arith.constant 0 : i32
    %2 = arith.cmpi ne, %1, %c0_i32_0 : i32
    scf.if %2 {
      %cst_27 = arith.constant -1.000000e+30 : f32
      %39 = vector.broadcast %cst_27 : f32 to vector<16x1xf32>
      %c0_28 = arith.constant 0 : index
      %c0_29 = arith.constant 0 : index
      %40 = vector.load %arg6[%c0_28, %c0_29] : memref<16x1xf32, #tpu.memory_space<vmem>>, vector<16x1xf32>
      tpu.vector_store %arg6[%c0_28, %c0_29], %39 {strides = array<i32>} : memref<16x1xf32, #tpu.memory_space<vmem>>, vector<16x1xf32>,
      %cst_30 = arith.constant 0.000000e+00 : f32
      %41 = vector.broadcast %cst_30 : f32 to vector<16x1xf32>
      %c0_31 = arith.constant 0 : index
      %c0_32 = arith.constant 0 : index
      %42 = vector.load %arg7[%c0_31, %c0_32] : memref<16x1xf32, #tpu.memory_space<vmem>>, vector<16x1xf32>
      tpu.vector_store %arg7[%c0_31, %c0_32], %41 {strides = array<i32>} : memref<16x1xf32, #tpu.memory_space<vmem>>, vector<16x1xf32>,
      %cst_33 = arith.constant 0.000000e+00 : f32
      %43 = vector.broadcast %cst_33 : f32 to vector<16x8xf32>
      %c0_34 = arith.constant 0 : index
      %c0_35 = arith.constant 0 : index
      %44 = vector.load %arg8[%c0_34, %c0_35] : memref<16x8xf32, #tpu.memory_space<vmem>>, vector<16x8xf32>
      tpu.vector_store %arg8[%c0_34, %c0_35], %43 {strides = array<i32>} : memref<16x8xf32, #tpu.memory_space<vmem>>, vector<16x8xf32>,
    } else {
    }
    %c0 = arith.constant 0 : index
    %c0_1 = arith.constant 0 : index
    %c0_2 = arith.constant 0 : index
    %3 = vector.load %arg2[%c0, %c0_1, %c0_2] : memref<2x8x8xbf16, #tpu.memory_space<vmem>>, vector<2x8x8xbf16>
    %4 = vector.shape_cast %3 : vector<2x8x8xbf16> to vector<16x8xbf16>
    %c0_3 = arith.constant 0 : index
    %c0_4 = arith.constant 0 : index
    %c0_5 = arith.constant 0 : index
    %5 = vector.load %arg3[%c0_3, %c0_4, %c0_5] : memref<1x8x8xbf16, #tpu.memory_space<vmem>>, vector<1x8x8xbf16>
    %6 = vector.shape_cast %5 : vector<1x8x8xbf16> to vector<8x8xbf16>
    %c0_6 = arith.constant 0 : index
    %c0_7 = arith.constant 0 : index
    %c0_8 = arith.constant 0 : index
    %7 = vector.load %arg4[%c0_6, %c0_7, %c0_8] : memref<1x8x8xbf16, #tpu.memory_space<vmem>>, vector<1x8x8xbf16>
    %8 = vector.shape_cast %7 : vector<1x8x8xbf16> to vector<8x8xbf16>
    %9 = tpu.transpose %6, [1, 0] : vector<8x8xbf16> -> vector<8x8xbf16>
    %cst = arith.constant dense<0.000000e+00> : vector<16x8xf32>
    %10 = tpu.matmul %4, %9, %cst {dimension_numbers = #tpu.dot_dimension_numbers<[1], [0], [0], [1], [0, 0, 1, 1], [], []>} : vector<16x8xbf16>, vector<8x8xbf16>, vector<16x8xf32> -> vector<16x8xf32>
    %cst_9 = arith.constant 0.353553385 : f32
    %11 = vector.broadcast %cst_9 : f32 to vector<16x8xf32>
    %12 = arith.mulf %10, %11 : vector<16x8xf32>
    %c0_10 = arith.constant 0 : index
    %c0_11 = arith.constant 0 : index
    %13 = vector.load %arg6[%c0_10, %c0_11] : memref<16x1xf32, #tpu.memory_space<vmem>>, vector<16x1xf32>
    %cst_12 = arith.constant dense<0xFF800000> : vector<16xf32>
    %14 = vector.multi_reduction <maximumf>, %12, %cst_12 [1] : vector<16x8xf32> to vector<16xf32>
    %15 = vector.shape_cast %14 : vector<16xf32> to vector<16x1xf32>
    %16 = arith.maximumf %13, %15 : vector<16x1xf32>
    %17 = arith.subf %13, %16 : vector<16x1xf32>
    %18 = math.exp %17 : vector<16x1xf32>
    %19 = vector.broadcast %16 : vector<16x1xf32> to vector<16x8xf32>
    %20 = arith.subf %12, %19 : vector<16x8xf32>
    %21 = math.exp %20 : vector<16x8xf32>
    %c0_13 = arith.constant 0 : index
    %c0_14 = arith.constant 0 : index
    %22 = vector.load %arg7[%c0_13, %c0_14] : memref<16x1xf32, #tpu.memory_space<vmem>>, vector<16x1xf32>
    %23 = arith.mulf %18, %22 : vector<16x1xf32>
    %cst_15 = arith.constant dense<0.000000e+00> : vector<16xf32>
    %24 = vector.multi_reduction <add>, %21, %cst_15 [1] : vector<16x8xf32> to vector<16xf32>
    %25 = vector.shape_cast %24 : vector<16xf32> to vector<16x1xf32>
    %26 = arith.addf %23, %25 : vector<16x1xf32>
    %c0_16 = arith.constant 0 : index
    %c0_17 = arith.constant 0 : index
    %27 = vector.load %arg7[%c0_16, %c0_17] : memref<16x1xf32, #tpu.memory_space<vmem>>, vector<16x1xf32>
    tpu.vector_store %arg7[%c0_16, %c0_17], %26 {strides = array<i32>} : memref<16x1xf32, #tpu.memory_space<vmem>>, vector<16x1xf32>,
    %c0_18 = arith.constant 0 : index
    %c0_19 = arith.constant 0 : index
    %28 = vector.load %arg8[%c0_18, %c0_19] : memref<16x8xf32, #tpu.memory_space<vmem>>, vector<16x8xf32>
    %29 = vector.broadcast %18 : vector<16x1xf32> to vector<16x8xf32>
    %30 = arith.mulf %29, %28 : vector<16x8xf32>
    %31 = arith.truncf %21 : vector<16x8xf32> to vector<16x8xbf16>
    %cst_20 = arith.constant dense<0.000000e+00> : vector<16x8xf32>
    %32 = tpu.matmul %31, %8, %cst_20 {dimension_numbers = #tpu.dot_dimension_numbers<[1], [0], [0], [1], [0, 0, 1, 1], [], []>} : vector<16x8xbf16>, vector<8x8xbf16>, vector<16x8xf32> -> vector<16x8xf32>
    %33 = arith.addf %30, %32 : vector<16x8xf32>
    %c0_21 = arith.constant 0 : index
    %c0_22 = arith.constant 0 : index
    %34 = vector.load %arg8[%c0_21, %c0_22] : memref<16x8xf32, #tpu.memory_space<vmem>>, vector<16x8xf32>
    tpu.vector_store %arg8[%c0_21, %c0_22], %33 {strides = array<i32>} : memref<16x8xf32, #tpu.memory_space<vmem>>, vector<16x8xf32>,
    %c0_23 = arith.constant 0 : index
    %c0_24 = arith.constant 0 : index
    %35 = vector.load %arg6[%c0_23, %c0_24] : memref<16x1xf32, #tpu.memory_space<vmem>>, vector<16x1xf32>
    tpu.vector_store %arg6[%c0_23, %c0_24], %16 {strides = array<i32>} : memref<16x1xf32, #tpu.memory_space<vmem>>, vector<16x1xf32>,
    %c0_i32_25 = arith.constant 0 : i32
    %36 = arith.cmpi eq, %arg1, %c0_i32_25 : i32
    %37 = arith.extui %36 : i1 to i32
    %c0_i32_26 = arith.constant 0 : i32
    %38 = arith.cmpi ne, %37, %c0_i32_26 : i32
    scf.if %38 {
      %c0_27 = arith.constant 0 : index
      %c0_28 = arith.constant 0 : index
      %39 = vector.load %arg7[%c0_27, %c0_28] : memref<16x1xf32, #tpu.memory_space<vmem>>, vector<16x1xf32>
      %40 = tpu.reciprocal %39 {approx = true} : vector<16x1xf32> -> vector<16x1xf32>
      %c0_29 = arith.constant 0 : index
      %c0_30 = arith.constant 0 : index
      %41 = vector.load %arg8[%c0_29, %c0_30] : memref<16x8xf32, #tpu.memory_space<vmem>>, vector<16x8xf32>
      %42 = vector.broadcast %40 : vector<16x1xf32> to vector<16x8xf32>
      %43 = arith.mulf %41, %42 : vector<16x8xf32>
      %44 = vector.shape_cast %43 : vector<16x8xf32> to vector<2x8x8xf32>
      %45 = arith.truncf %44 : vector<2x8x8xf32> to vector<2x8x8xbf16>
      %c0_31 = arith.constant 0 : index
      %c0_32 = arith.constant 0 : index
      %c0_33 = arith.constant 0 : index
      %46 = vector.load %arg5[%c0_31, %c0_32, %c0_33] : memref<2x8x8xbf16, #tpu.memory_space<vmem>>, vector<2x8x8xbf16>
      tpu.vector_store %arg5[%c0_31, %c0_32, %c0_33], %45 {strides = array<i32>} : memref<2x8x8xbf16, #tpu.memory_space<vmem>>, vector<2x8x8xbf16>,
    } else {
    }
    return
  }
  func.func @transform_0(%arg0: i32, %arg1: i32) -> (i32, i32, i32) {
    %c0_i32 = arith.constant 0 : i32
    %c0_i32_0 = arith.constant 0 : i32
    %c0_i32_1 = arith.constant 0 : i32
    return %arg0, %c0_i32, %c0_i32_0 : i32, i32, i32
  }
  func.func @transform_1(%arg0: i32, %arg1: i32) -> (i32, i32, i32) {
    %c0_i32 = arith.constant 0 : i32
    %c0_i32_0 = arith.constant 0 : i32
    return %arg0, %arg1, %c0_i32 : i32, i32, i32
  }
  func.func @transform_2(%arg0: i32, %arg1: i32) -> (i32, i32, i32) {
    %c0_i32 = arith.constant 0 : i32
    %c0_i32_0 = arith.constant 0 : i32
    return %arg0, %arg1, %c0_i32 : i32, i32, i32
  }
  func.func @transform_3(%arg0: i32, %arg1: i32) -> (i32, i32, i32) {
    %c0_i32 = arith.constant 0 : i32
    %c0_i32_0 = arith.constant 0 : i32
    %c0_i32_1 = arith.constant 0 : i32
    return %arg0, %c0_i32, %c0_i32_0 : i32, i32, i32
  }
}

module attributes {stable_mosaic.version = 11 : i64} {
  func.func @_rmsnorm_kernel(%arg0: i32, %arg1: memref<16x32xbf16, #tpu.memory_space<vmem>>, %arg2: memref<1x32xf32, #tpu.memory_space<vmem>>, %arg3: memref<16x32xbf16, #tpu.memory_space<vmem>>) attributes {dimension_semantics = [#tpu.dimension_semantics<parallel>], iteration_bounds = array<i64: 1>, scalar_prefetch = 0 : i64, scratch_operands = 0 : i64, tpu.core_type = #tpu.core_type<tc>, window_params = [{transform_indices = @transform_0, window_bounds = array<i64: 16, 32>}, {pipeline_mode = #tpu.pipeline_mode<synchronous>, transform_indices = @transform_1, window_bounds = array<i64: 1, 32>}, {transform_indices = @transform_2, window_bounds = array<i64: 16, 32>}]} {
    %c0 = arith.constant 0 : index
    %c0_0 = arith.constant 0 : index
    %0 = vector.load %arg1[%c0, %c0_0] : memref<16x32xbf16, #tpu.memory_space<vmem>>, vector<16x32xbf16>
    %1 = arith.extf %0 : vector<16x32xbf16> to vector<16x32xf32>
    %2 = arith.mulf %1, %1 : vector<16x32xf32>
    %cst = arith.constant dense<0.000000e+00> : vector<16xf32>
    %3 = vector.multi_reduction <add>, %2, %cst [1] : vector<16x32xf32> to vector<16xf32>
    %4 = vector.shape_cast %3 : vector<16xf32> to vector<16x1xf32>
    %cst_1 = arith.constant 3.200000e+01 : f32
    %5 = vector.broadcast %cst_1 : f32 to vector<16x1xf32>
    %6 = arith.divf %4, %5 : vector<16x1xf32>
    %cst_2 = arith.constant 9.99999997E-7 : f32
    %7 = vector.broadcast %cst_2 : f32 to vector<16x1xf32>
    %8 = arith.addf %6, %7 : vector<16x1xf32>
    %9 = math.rsqrt %8 : vector<16x1xf32>
    %10 = vector.broadcast %9 : vector<16x1xf32> to vector<16x32xf32>
    %11 = arith.mulf %1, %10 : vector<16x32xf32>
    %c0_3 = arith.constant 0 : index
    %c0_4 = arith.constant 0 : index
    %12 = vector.load %arg2[%c0_3, %c0_4] : memref<1x32xf32, #tpu.memory_space<vmem>>, vector<1x32xf32>
    %13 = vector.broadcast %12 : vector<1x32xf32> to vector<16x32xf32>
    %14 = arith.mulf %11, %13 : vector<16x32xf32>
    %15 = arith.truncf %14 : vector<16x32xf32> to vector<16x32xbf16>
    %c0_5 = arith.constant 0 : index
    %c0_6 = arith.constant 0 : index
    %16 = vector.load %arg3[%c0_5, %c0_6] : memref<16x32xbf16, #tpu.memory_space<vmem>>, vector<16x32xbf16>
    tpu.vector_store %arg3[%c0_5, %c0_6], %15 {strides = array<i32>} : memref<16x32xbf16, #tpu.memory_space<vmem>>, vector<16x32xbf16>,
    return
  }
  func.func @transform_0(%arg0: i32) -> (i32, i32) {
    %c0_i32 = arith.constant 0 : i32
    %c0_i32_0 = arith.constant 0 : i32
    return %arg0, %c0_i32 : i32, i32
  }
  func.func @transform_1(%arg0: i32) -> (i32, i32) {
    %c0_i32 = arith.constant 0 : i32
    %c0_i32_0 = arith.constant 0 : i32
    %c0_i32_1 = arith.constant 0 : i32
    return %c0_i32, %c0_i32_0 : i32, i32
  }
  func.func @transform_2(%arg0: i32) -> (i32, i32) {
    %c0_i32 = arith.constant 0 : i32
    %c0_i32_0 = arith.constant 0 : i32
    return %arg0, %c0_i32 : i32, i32
  }
}

</mosaic_0001>

<bundles_post_ra>
// kernel: transformer_decoder.20
= control target key start
LH: loop header
LB: loop body
LE: loop exit
PB: predicated region body
PF: predicated region fallthrough
CT: control target
= control target key end

     0   :  { %vm17_vm0 = vcmask 261120   ;;  %v84_v7 = vmov 32.0   ;;  %vm65_vm5 = vcmask 257024   ;;  %s112_s0 = inlined_call_operand.vmem [shape: bf16[16,32], index: 0, kind: input, shape index: {}]   ;;  %s113_s1 = inlined_call_operand.vmem [shape: f32[1,32], index: 1, kind: input, shape index: {}]   ;;  %s114_s2 = inlined_call_operand.vmem [shape: bf16[16,32], index: 2, kind: output, shape index: {}]  }
   0x1   :  { %v73_v0 = vld [vmem:[%s112_s0] sm:$0xff]   ;;  %78 = vrcp.f32 %v84_v7 }
   0x2   :  { %v74_v1 = vunpack.c.l.bf16 %v73_v0  ;;  %v75_v3 = vunpack.c.h.bf16 %v73_v0  ;;  %v77_v28 = vld [vmem:[%s113_s1] ss:$0 sm:$0xff] }
   0x4   :  { %v15_v2 = vmul.f32 %v74_v1, %v74_v1  ;;  %v16_v5 = vmul.f32 %v75_v3, %v75_v3 }
   0x6   :  { %v18_v4 = vsel %vm17_vm0, %v15_v2, 0.0  ;;  %v21_v6 = vsel %vm17_vm0, %v16_v5, 0.0 }
   0x7   :  { %19 = vadd.xlane.f32.xlu0 %v18_v4  ;;  %v79_v8 = vpop.eup %78 }
   0x8   :  { %v25_v9 = vmul.f32 32.0, %v79_v8  ;;  %vm29_vm1 = vweird.f32 %v79_v8 }
   0xa   :  { %v26_v10 = vsub.f32 1.0, %v25_v9 }
   0xc   :  { %v27_v11 = vmul.f32 %v79_v8, %v26_v10 }
   0xe   :  { %v28_v12 = vadd.f32 %v79_v8, %v27_v11 }
   0xf   :  { %22 = vadd.xlane.f32.xlu0 %v21_v6 }
  0x10   :  { %v30_v13 = vsel %vm29_vm1, %v79_v8, %v28_v12 }
  0x7a   :  { %v20_v14 = vpop.xlane.xlu0 %19 }
  0x7b   :  { %v31_v15 = vmul.f32 %v30_v13, %v20_v14 }
  0x7d   :  { %v33_v16 = vadd.f32 1e-06, %v31_v15 }
  0x7f   :  { %80 = vrsqrt.f32 %v33_v16  ;;  %vm41_vm3 = vweird.f32 %v33_v16 }
  0x82   :  { %v23_v17 = vpop.xlane.xlu0 %22 }
  0x83   :  { %v32_v18 = vmul.f32 %v30_v13, %v23_v17 }
  0x85   :  { %v81_v19 = vpop.eup %80  ;;  %v34_v20 = vadd.f32 1e-06, %v32_v18 }
  0x86   :  { %v36_v21 = vmul.f32 %v81_v19, %v33_v16  ;;  %vm42_vm2 = vweird.f32 %v81_v19 }
  0x87   :  { %82 = vrsqrt.f32 %v34_v20  ;;  %vm43_vm4 = vmor %vm41_vm3, %vm42_vm2  ;;  %vm51_vm7 = vweird.f32 %v34_v20 }
  0x88   :  { %v37_v22 = vmul.f32 %v81_v19, %v36_v21 }
  0x8a   :  { %v38_v23 = vmul.f32 0.5, %v37_v22 }
  0x8c   :  { %v39_v24 = vsub.f32 1.5, %v38_v23 }
  0x8d   :  { %v83_v25 = vpop.eup %82 }
  0x8e   :  { %v40_v26 = vmul.f32 %v81_v19, %v39_v24  ;;  %v46_v27 = vmul.f32 %v83_v25, %v34_v20  ;;  %vm52_vm6 = vweird.f32 %v83_v25 }
  0x8f   :  { %vm53_vm8 = vmor %vm51_vm7, %vm52_vm6 }
  0x90   :  { %v44_v29 = vsel %vm43_vm4, %v81_v19, %v40_v26  ;;  %v47_v30 = vmul.f32 %v83_v25, %v46_v27 }
  0x91   :  { %v55_v31 = vmul.f32 %v74_v1, %v44_v29 }
  0x92   :  { %v48_v32 = vmul.f32 0.5, %v47_v30 }
  0x93   :  { %v61_v33 = vmul.f32 %v77_v28, %v55_v31 }
  0x94   :  { %v49_v34 = vsub.f32 1.5, %v48_v32 }
  0x95   :  { %v63_v35 = vpack.c.bf16 %v61_v33, %v61_v33 }
  0x96   :  { %v50_v36 = vmul.f32 %v83_v25, %v49_v34 }
  0x97   :  { %66 = vst.msk [vmem:[%s114_s2] sm:$0xf] %vm65_vm5, %v63_v35 }
  0x98   :  { %v54_v37 = vsel %vm53_vm8, %v83_v25, %v50_v36 }
  0x99   :  { %v56_v38 = vmul.f32 %v75_v3, %v54_v37 }
  0x9b   :  { %v62_v39 = vmul.f32 %v77_v28, %v56_v38 }
  0x9d   :  { %v64_v40 = vpack.c.bf16 %v62_v39, %v62_v39 }
  0x9f   :  { %67 = vst.msk [vmem:[%s114_s2 + $0x4] sm:$0xf] %vm65_vm5, %v64_v40 }

// kernel: transformer_decoder.21
= control target key start
LH: loop header
LB: loop body
LE: loop exit
PB: predicated region body
PF: predicated region fallthrough
CT: control target
= control target key end

     0   :  { %vm21_vm0 = vcmask 261120   ;;  %v133_v7 = vmov 32.0   ;;  %vm103_vm8 = vcmask 519168   ;;  %s175_s0 = inlined_call_operand.vmem [shape: bf16[16,32], index: 0, kind: input, shape index: {}]   ;;  %s176_s1 = inlined_call_operand.vmem [shape: f32[1,32], index: 1, kind: input, shape index: {}]   ;;  %s177_s2 = inlined_call_operand.vmem [shape: bf16[32,64], index: 2, kind: input, shape index: {}]   ;;  %s178_s3 = inlined_call_operand.vmem [shape: bf16[16,64], index: 3, kind: output, shape index: {}]  }
   0x1   :  { %v122_v0 = vld [vmem:[%s175_s0] sm:$0xff]   ;;  %127 = vrcp.f32 %v133_v7  ;;  %v120_v13 = vld [vmem:[%s177_s2 + $0x8] sm:$0xff] }
   0x2   :  { %v123_v1 = vunpack.c.l.bf16 %v122_v0  ;;  %v124_v3 = vunpack.c.h.bf16 %v122_v0  ;;  %93 = vmatpush.bf16.msra.mxu0 %v120_v13  ;;  %v119_v15 = vld [vmem:[%s177_s2] sm:$0xff] }
   0x3   :  { %v126_v36 = vld [vmem:[%s176_s1] ss:$0 sm:$0xff] }
   0x4   :  { %v19_v2 = vmul.f32 %v123_v1, %v123_v1  ;;  %v20_v5 = vmul.f32 %v124_v3, %v124_v3 }
   0x6   :  { %v22_v4 = vsel %vm21_vm0, %v19_v2, 0.0  ;;  %v25_v6 = vsel %vm21_vm0, %v20_v5, 0.0  ;;  %94 = vmatpush.bf16.msra.mxu0 %v119_v15 }
   0x7   :  { %23 = vadd.xlane.f32.xlu0 %v22_v4  ;;  %v128_v8 = vpop.eup %127 }
   0x8   :  { %v29_v9 = vmul.f32 32.0, %v128_v8  ;;  %vm33_vm1 = vweird.f32 %v128_v8 }
   0xa   :  { %v30_v10 = vsub.f32 1.0, %v29_v9 }
   0xc   :  { %v31_v11 = vmul.f32 %v128_v8, %v30_v10 }
   0xe   :  { %v32_v12 = vadd.f32 %v128_v8, %v31_v11 }
   0xf   :  { %26 = vadd.xlane.f32.xlu0 %v25_v6 }
  0x10   :  { %v34_v14 = vsel %vm33_vm1, %v128_v8, %v32_v12 }
  0x7a   :  { %v24_v16 = vpop.xlane.xlu0 %23 }
  0x7b   :  { %v35_v17 = vmul.f32 %v34_v14, %v24_v16 }
  0x7d   :  { %v37_v18 = vadd.f32 1e-06, %v35_v17 }
  0x7f   :  { %129 = vrsqrt.f32 %v37_v18  ;;  %vm45_vm3 = vweird.f32 %v37_v18 }
  0x82   :  { %v27_v19 = vpop.xlane.xlu0 %26 }
  0x83   :  { %v36_v20 = vmul.f32 %v34_v14, %v27_v19 }
  0x85   :  { %v130_v21 = vpop.eup %129  ;;  %v38_v22 = vadd.f32 1e-06, %v36_v20 }
  0x86   :  { %v40_v23 = vmul.f32 %v130_v21, %v37_v18  ;;  %vm46_vm2 = vweird.f32 %v130_v21 }
  0x87   :  { %131 = vrsqrt.f32 %v38_v22  ;;  %vm47_vm4 = vmor %vm45_vm3, %vm46_vm2  ;;  %vm55_vm6 = vweird.f32 %v38_v22 }
  0x88   :  { %v41_v24 = vmul.f32 %v130_v21, %v40_v23 }
  0x8a   :  { %v42_v25 = vmul.f32 0.5, %v41_v24 }
  0x8c   :  { %v43_v26 = vsub.f32 1.5, %v42_v25 }
  0x8d   :  { %v132_v27 = vpop.eup %131 }
  0x8e   :  { %v50_v28 = vmul.f32 %v132_v27, %v38_v22  ;;  %v44_v29 = vmul.f32 %v130_v21, %v43_v26  ;;  %vm56_vm5 = vweird.f32 %v132_v27 }
  0x8f   :  { %vm57_vm7 = vmor %vm55_vm6, %vm56_vm5 }
  0x90   :  { %v51_v30 = vmul.f32 %v132_v27, %v50_v28  ;;  %v48_v32 = vsel %vm47_vm4, %v130_v21, %v44_v29 }
  0x91   :  { %v59_v35 = vmul.f32 %v123_v1, %v48_v32 }
  0x92   :  { %v52_v31 = vmul.f32 0.5, %v51_v30 }
  0x93   :  { %v65_v39 = vmul.f32 %v126_v36, %v59_v35 }
  0x94   :  { %v53_v33 = vsub.f32 1.5, %v52_v31 }
  0x96   :  { %v54_v34 = vmul.f32 %v132_v27, %v53_v33 }
  0x98   :  { %v58_v37 = vsel %vm57_vm7, %v132_v27, %v54_v34 }
  0x99   :  { %v60_v38 = vmul.f32 %v124_v3, %v58_v37 }
  0x9b   :  { %v66_v40 = vmul.f32 %v126_v36, %v60_v38 }
  0x9d   :  { %v67_v41 = vpack.c.bf16 %v66_v40, %v65_v39 }
  0x9f   :  { %118 = vmatmul.msk.bf16.vlgmr.msra.gmra.mxu0 %vm21_vm0, %v67_v41 }
 0x11c   :  { %v96_v42 = vpop.f32.mrf.mxu0 }
 0x11d   :  { %v101_v43 = vpack.c.bf16 %v96_v42, %v96_v42 }
 0x11f   :  { %104 = vst.msk [vmem:[%s178_s3] sm:$0xf] %vm103_vm8, %v101_v43 }
 0x124   :  { %v98_v44 = vpop.f32.mrf.mxu0 }
 0x125   :  { %v102_v45 = vpack.c.bf16 %v98_v44, %v98_v44 }
 0x127   :  { %105 = vst.msk [vmem:[%s178_s3 + $0x4] sm:$0xf] %vm103_vm8, %v102_v45 }

// kernel: transformer_decoder.23
= control target key start
LH: loop header
LB: loop body
LE: loop exit
PB: predicated region body
PF: predicated region fallthrough
CT: control target
= control target key end

     0   :  { %s534_s12 = smov 0   ;;  %s536_s13 = smov 0   ;;  %s598_s0 = inlined_call_operand.vmem [shape: bf16[8,8,8], index: 0, kind: input, shape index: {}]   ;;  %s599_s1 = inlined_call_operand.vmem [shape: bf16[32,32], index: 1, kind: input, shape index: {}]   ;;  %s600_s2 = inlined_call_operand.vmem [shape: bf16[2,8,32], index: 2, kind: input, shape index: {}]   ;;  %s601_s3 = inlined_call_operand.vmem [shape: bf16[2,8,32], index: 3, kind: output, shape index: {}]  }
   0x1   :  { %s538_s14 = smov 0   ;;  %s540_s15 = smov 0  }
   0x2   :  { %s542_s16 = smov 0  }
   0x3 LB: > { %s25_s17 = sadd.s32 1, %s503_s14  ;;  %s32_s18 = sadd.s32 1, %s507_s15  ;;  %s511_s16 = sphi %s542_s16, %s13_s16   ;;  %s507_s15 = sphi %s540_s15, %s605_s15   ;;  %s503_s14 = sphi %s538_s14, %s604_s14   ;;  %s499_s13 = sphi %s536_s13, %s603_s13   ;;  %s495_s12 = sphi %s534_s12, %s602_s12  }
   0x4   : > { %p26_p0 = scmp.ge.s32.totalorder %s25_s17, 4  ;;  %p421_p1 = scmp.ge.s32.totalorder %s511_s16, 1 }
   0x5   : > { %p193_p2 = scmp.lt.s32.totalorder %s511_s16, 9 }
   0x6   : > { %s607_s17 = smov (%p26_p0, %s25_s17), 0  ;;  %s609_s18 = smov (!%p26_p0, %s32_s18), %s507_s15 }
   0x7   : > { %p194_p3 = pnand %p421_p1, %p193_p2  ;;  %p34_p4 = scmp.ge.s32.totalorder %s609_s18, 2 }
   0x8   : > { %s422_s19 = sshll.u32 (!%p194_p3), %s499_s13, 2  ;;  %p242_p5 = scmp.lt.s32.totalorder (!%p194_p3), %s495_s12, 3 }
   0x9   : > { %s611_s18 = smov (%p34_p4, %s609_s18), 0  ;;  %197 = sbr.rel (%p194_p3) target bundleno = 172 (0xac), region = 32 }
   0xa   : > { %s235_s20 = sadd.s32 (!%p194_p3), %s495_s12, %s422_s19  ;;  %p249_p7 = scmp.lt.s32.totalorder (!%p194_p3), %s499_s13, 1 }
   0xb   : > { %p236_p6 = scmp.lt.s32.totalorder (!%p194_p3), %s235_s20, 7  ;;  %p427_p8 = scmp.ne.s32.totalorder (!%p194_p3), %s495_s12, 0 }
   0xe   : > { %s243_s21 = scalar_select %p242_p5, %s495_s12, 3 }
   0xf   : > { %s613_s20 = smov (!%p236_p6, %s235_s20), 7  ;;  %s615_s13 = smov (!%p249_p7, %s499_s13), 1 }
  0x10   : > { %s424_s22 = sshll.u32 %s243_s21, 2  ;;  %s423_s23 = sshll.u32 %s613_s20, 2 }
  0x11   : > { %s248_s26 = scalar_lea.vmem %s599_s1, %s424_s22  ;;  %s239_s29 = scalar_lea.vmem %s598_s0, %s423_s23 }
  0x12   : > { %s425_s30 = sshll.u32 %s615_s13, 2  ;;  %267 = sbr.rel (%p427_p8) target bundleno = 25 (0x19), region = 36 }
  0x13   : > { %s255_s6 = scalar_lea.vmem %s600_s2, %s425_s30  ;;  %s262_s9 = scalar_lea.vmem %s601_s3, %s425_s30 }
  0x17   : > { %vm268_vm0 = vcmask 261120   ;;  %v513_v0 = vmov 0.0  }
  0x18   : > { %269 = vst.msk [vmem:[#allocation2] sm:$0xff] %vm268_vm0, %v513_v0 }
  0x19 PF: > { %v272_v1 = vld [vmem:[%s248_s26] sm:$0xf]  ;;  %vm277_vm1 = vcmask 1043456   ;;  %vm273_vm2 = vcmask 64512   ;;  %vm295_vm3 = vcmask 261120   ;;  %p429_p9 = scmp.ne.s32.totalorder %s495_s12, 3 }
  0x1a   : > { %v279_v2 = vsel %vm277_vm1, %v272_v1, 0  ;;  %v271_v3 = vld [vmem:[%s239_s29] sm:$0xf] }
  0x1b   : > { %288 = vmatpush.bf16.msra.mxu0 %v279_v2 }
  0x1e   : > { %428 = vmatmul.msk.bf16.vlgmr.msra.gmra.mxu0 %vm273_vm2, %v271_v3 }
  0x1f   : > { %v270_v4 = vld [vmem:[#allocation2] sm:$0xff] }
  0x9b   : > { %v290_v5 = vpop.f32.mrf.mxu0 }
  0x9c   : > { %v294_v6 = vadd.f32 %v290_v5, %v270_v4 }
  0x9e   : > { %296 = vst.msk [vmem:[#allocation2] sm:$0xff] %vm295_vm3, %v294_v6 }
  0x9f   : > { %300 = sbr.rel (%p429_p9) target bundleno = 172 (0xac), region = 40 }
  0xa3   : > { %v292_v7 = vpop.f32.mrf.mxu0 }
  0xa4   : > { %v302_v9 = vld [vmem:[%s255_s6] sm:$0xf]  ;;  %vm306_vm4 = vcmask 257024  }
  0xa5   : > { %v301_v8 = vld [vmem:[#allocation2] sm:$0xff]  ;;  %v303_v10 = vunpack.c.l.bf16 %v302_v9 }
  0xa7   : > { %v304_v11 = vadd.f32 %v303_v10, %v301_v8 }
  0xa9   : > { %v305_v12 = vpack.c.bf16 %v304_v11, %v304_v11 }
  0xab   : > { %307 = vst.msk [vmem:[%s262_s9] sm:$0xf] %vm306_vm4, %v305_v12 }
  0xac PF: > { %s13_s16 = sadd.s32 1, %s511_s16   ;;  %s602_s12 = smov %s503_s14 }
  0xad   : > { %p10_p10 = scmp.ge.s32.totalorder %s13_s16, 10   ;;  %s603_s13 = smov %s507_s15 }
  0xae   : > { %s604_s14 = smov %s607_s17  ;;  %s605_s15 = smov %s611_s18 }
  0xaf   :  { %12 = sbr.rel (!%p10_p10) target bundleno = 3 (0x3), region = 76 }

// kernel: transformer_decoder.25
= control target key start
LH: loop header
LB: loop body
LE: loop exit
PB: predicated region body
PF: predicated region fallthrough
CT: control target
= control target key end

     0   :  { %vm21_vm0 = vcmask 261120   ;;  %v133_v7 = vmov 32.0   ;;  %vm103_vm8 = vcmask 257024   ;;  %s175_s0 = inlined_call_operand.vmem [shape: bf16[16,32], index: 0, kind: input, shape index: {}]   ;;  %s176_s1 = inlined_call_operand.vmem [shape: f32[1,32], index: 1, kind: input, shape index: {}]   ;;  %s177_s2 = inlined_call_operand.vmem [shape: bf16[32,32], index: 2, kind: input, shape index: {}]   ;;  %s178_s3 = inlined_call_operand.vmem [shape: bf16[16,32], index: 3, kind: output, shape index: {}]  }
   0x1   :  { %v122_v0 = vld [vmem:[%s175_s0] sm:$0xff]   ;;  %127 = vrcp.f32 %v133_v7  ;;  %v120_v13 = vld [vmem:[%s177_s2 + $0x8] sm:$0xff] }
   0x2   :  { %v123_v1 = vunpack.c.l.bf16 %v122_v0  ;;  %v124_v3 = vunpack.c.h.bf16 %v122_v0  ;;  %93 = vmatpush.bf16.msra.mxu0 %v120_v13  ;;  %v119_v15 = vld [vmem:[%s177_s2] sm:$0xff] }
   0x3   :  { %v126_v36 = vld [vmem:[%s176_s1] ss:$0 sm:$0xff] }
   0x4   :  { %v19_v2 = vmul.f32 %v123_v1, %v123_v1  ;;  %v20_v5 = vmul.f32 %v124_v3, %v124_v3 }
   0x6   :  { %v22_v4 = vsel %vm21_vm0, %v19_v2, 0.0  ;;  %v25_v6 = vsel %vm21_vm0, %v20_v5, 0.0  ;;  %94 = vmatpush.bf16.msra.mxu0 %v119_v15 }
   0x7   :  { %23 = vadd.xlane.f32.xlu0 %v22_v4  ;;  %v128_v8 = vpop.eup %127 }
   0x8   :  { %v29_v9 = vmul.f32 32.0, %v128_v8  ;;  %vm33_vm1 = vweird.f32 %v128_v8 }
   0xa   :  { %v30_v10 = vsub.f32 1.0, %v29_v9 }
   0xc   :  { %v31_v11 = vmul.f32 %v128_v8, %v30_v10 }
   0xe   :  { %v32_v12 = vadd.f32 %v128_v8, %v31_v11 }
   0xf   :  { %26 = vadd.xlane.f32.xlu0 %v25_v6 }
  0x10   :  { %v34_v14 = vsel %vm33_vm1, %v128_v8, %v32_v12 }
  0x7a   :  { %v24_v16 = vpop.xlane.xlu0 %23 }
  0x7b   :  { %v35_v17 = vmul.f32 %v34_v14, %v24_v16 }
  0x7d   :  { %v37_v18 = vadd.f32 1e-06, %v35_v17 }
  0x7f   :  { %129 = vrsqrt.f32 %v37_v18  ;;  %vm45_vm3 = vweird.f32 %v37_v18 }
  0x82   :  { %v27_v19 = vpop.xlane.xlu0 %26 }
  0x83   :  { %v36_v20 = vmul.f32 %v34_v14, %v27_v19 }
  0x85   :  { %v130_v21 = vpop.eup %129  ;;  %v38_v22 = vadd.f32 1e-06, %v36_v20 }
  0x86   :  { %v40_v23 = vmul.f32 %v130_v21, %v37_v18  ;;  %vm46_vm2 = vweird.f32 %v130_v21 }
  0x87   :  { %131 = vrsqrt.f32 %v38_v22  ;;  %vm47_vm4 = vmor %vm45_vm3, %vm46_vm2  ;;  %vm55_vm6 = vweird.f32 %v38_v22 }
  0x88   :  { %v41_v24 = vmul.f32 %v130_v21, %v40_v23 }
  0x8a   :  { %v42_v25 = vmul.f32 0.5, %v41_v24 }
  0x8c   :  { %v43_v26 = vsub.f32 1.5, %v42_v25 }
  0x8d   :  { %v132_v27 = vpop.eup %131 }
  0x8e   :  { %v50_v28 = vmul.f32 %v132_v27, %v38_v22  ;;  %v44_v29 = vmul.f32 %v130_v21, %v43_v26  ;;  %vm56_vm5 = vweird.f32 %v132_v27 }
  0x8f   :  { %vm57_vm7 = vmor %vm55_vm6, %vm56_vm5 }
  0x90   :  { %v51_v30 = vmul.f32 %v132_v27, %v50_v28  ;;  %v48_v32 = vsel %vm47_vm4, %v130_v21, %v44_v29 }
  0x91   :  { %v59_v35 = vmul.f32 %v123_v1, %v48_v32 }
  0x92   :  { %v52_v31 = vmul.f32 0.5, %v51_v30 }
  0x93   :  { %v65_v39 = vmul.f32 %v126_v36, %v59_v35 }
  0x94   :  { %v53_v33 = vsub.f32 1.5, %v52_v31 }
  0x96   :  { %v54_v34 = vmul.f32 %v132_v27, %v53_v33 }
  0x98   :  { %v58_v37 = vsel %vm57_vm7, %v132_v27, %v54_v34 }
  0x99   :  { %v60_v38 = vmul.f32 %v124_v3, %v58_v37 }
  0x9b   :  { %v66_v40 = vmul.f32 %v126_v36, %v60_v38 }
  0x9d   :  { %v67_v41 = vpack.c.bf16 %v66_v40, %v65_v39 }
  0x9f   :  { %118 = vmatmul.msk.bf16.vlgmr.msra.gmra.mxu0 %vm21_vm0, %v67_v41 }
 0x11c   :  { %v96_v42 = vpop.f32.mrf.mxu0 }
 0x11d   :  { %v101_v43 = vpack.c.bf16 %v96_v42, %v96_v42 }
 0x11f   :  { %104 = vst.msk [vmem:[%s178_s3] sm:$0xf] %vm103_vm8, %v101_v43 }
 0x124   :  { %v98_v44 = vpop.f32.mrf.mxu0 }
 0x125   :  { %v102_v45 = vpack.c.bf16 %v98_v44, %v98_v44 }
 0x127   :  { %105 = vst.msk [vmem:[%s178_s3 + $0x4] sm:$0xf] %vm103_vm8, %v102_v45 }

// kernel: transformer_decoder.22
= control target key start
LH: loop header
LB: loop body
LE: loop exit
PB: predicated region body
PF: predicated region fallthrough
CT: control target
= control target key end

     0   :  { %s926_s24 = smov 0   ;;  %s928_s25 = smov 0   ;;  %s1013_s0 = inlined_call_operand.vmem [shape: bf16[8,8,8], index: 0, kind: input, shape index: {}]   ;;  %s1014_s1 = inlined_call_operand.vmem [shape: bf16[4,8,8], index: 1, kind: input, shape index: {}]   ;;  %s1015_s2 = inlined_call_operand.vmem [shape: bf16[4,8,8], index: 2, kind: input, shape index: {}]   ;;  %s1016_s3 = inlined_call_operand.vmem [shape: f32[8,8], index: 3, kind: input, shape index: {}, may-alias: {3,5}]   ;;  %s1017_s4 = inlined_call_operand.vmem [shape: f32[8,8], index: 4, kind: input, shape index: {}, may-alias: {4,6}]   ;;  %s1018_s5 = inlined_call_operand.vmem [shape: f32[8,8], index: 5, kind: input, shape index: {}, may-alias: {3,5}]   ;;  %s1019_s6 = inlined_call_operand.vmem [shape: f32[8,8], index: 6, kind: input, shape index: {}, may-alias: {4,6}]   ;;  %s1020_s7 = inlined_call_operand.vmem [shape: bf16[8,8,8], index: 7, kind: output, shape index: {}]  }
   0x1   :  { %s930_s26 = smov 0  }
   0x2 LB: > { %s29_s27 = sadd.s32 1, %s876_s25  ;;  %p794_p0 = scmp.ge.s32.totalorder %s880_s26, 1  ;;  %s880_s26 = sphi %s930_s26, %s17_s26   ;;  %s876_s25 = sphi %s928_s25, %s1022_s25   ;;  %s872_s24 = sphi %s926_s24, %s1021_s24  }
   0x3   : > { %p31_p1 = scmp.ge.s32.totalorder %s29_s27, 4  ;;  %p296_p2 = scmp.lt.s32.totalorder %s880_s26, 5 }
   0x5   : > { %s1024_s27 = smov (%p31_p1, %s29_s27), 0  ;;  %p297_p3 = pnand %p794_p0, %p296_p2 }
   0x6   : > { %s795_s28 = sshll.u32 (!%p297_p3), %s872_s24, 1  ;;  %p356_p4 = scmp.lt.s32.totalorder (!%p297_p3), %s872_s24, 3 }
   0x7   : > { %300 = sbr.rel (%p297_p3) target bundleno = 806 (0x326), region = 48  ;;  %p351_p5 = scmp.lt.s32.totalorder (!%p297_p3), %s795_s28, 7 }
   0xc   : > { %v401_v0 = vlaneseq  ;;  %s1026_s24 = smov (!%p356_p4, %s872_s24), 3  ;;  %s1028_s28 = smov (!%p351_p5, %s795_s28), 7  ;;  %vm394_vm0 = vcmask 64512   ;;  %v882_v11 = vmov 1.0   ;;  %v464_v13 = vld [vmem:[%s1018_s5] sm:$0xff]  ;;  %vm389_vm2 = vcmask 7168  }
   0xd   : > { %s797_s29 = sshll.u32 %s1026_s24, 2  ;;  %s796_s30 = sshll.u32 %s1028_s28, 2  ;;  %v489_v14 = vld [vmem:[%s1019_s6] sm:$0xff]  ;;  %v883_v32 = vmov -1e+30   ;;  %v884_v44 = vmov 0  }
   0xe   : > { %v402_v1 = vshrl.u32 %v401_v0, 7  ;;  %s362_s10 = scalar_lea.vmem %s1014_s1, %s797_s29  ;;  %v404_v4 = vand.u32 127, %v401_v0  ;;  %s354_s13 = scalar_lea.vmem %s1013_s0, %s796_s30  ;;  %v426_v20 = vld [vmem:[%s1016_s3] sm:$0xff]  ;;  %390 = vst.msk [vmem:[#allocation2] sm:$0xff] %vm389_vm2, %v883_v32  ;;  %843 = vset.pattern.permute.xlu1 %v884_v44  ;;  %844 = vset.pattern.permute.xlu0 %v884_v44  ;;  %v885_v45 = vmov 0.0   ;;  %vm613_vm5 = vcmask 1043456  }
   0xf   : > { %v399_v6 = vld [vmem:[%s362_s10] sm:$0xf]  ;;  %391 = vst.msk [vmem:[#allocation2 + $0x8] sm:$0xff] %vm389_vm2, %v883_v32  ;;  %845 = vset.pattern.permute.xlu2 %v884_v44  ;;  %s369_s8 = scalar_lea.vmem %s1015_s2, %s797_s29  ;;  %s382_s9 = scalar_lea.vmem %s1020_s7, %s796_s30  ;;  %vm660_vm6 = vcmask 60416  }
  0x10   : > { %v405_v2 = vadd.s32 1, %v402_v1  ;;  %v410_v3 = vand.u32 1, %v402_v1  ;;  %v812_v7 = vld [vmem:[%s354_s13] sm:$0xff]   ;;  %v425_v10 = vunpack.c.l.bf16 %v399_v6  ;;  %v521_v33 = vand.u32 7, %v402_v1  ;;  %395 = vst.msk [vmem:[#allocation4] sm:$0xff] %vm394_vm0, %v885_v45 }
  0x11   : > { %v813_v9 = vunpack.c.l.bf16 %v812_v7  ;;  %v814_v12 = vunpack.c.h.bf16 %v812_v7  ;;  %v427_v21 = vld [vmem:[%s1017_s4] sm:$0xff]  ;;  %v516_v35 = vadd.s32 8, %v402_v1  ;;  %392 = vst.msk [vmem:[#allocation3] sm:$0xff] %vm389_vm2, %v885_v45 }
  0x12   : > { %v418_v5 = vmul.u32 2, %v410_v3  ;;  %v465_v15 = vmul.f32 %v464_v13, %v425_v10  ;;  %vm544_vm3 = vcmp.le.s32.totalorder %v404_v4, %v521_v33  ;;  %393 = vst.msk [vmem:[#allocation3 + $0x8] sm:$0xff] %vm389_vm2, %v885_v45  ;;  %v400_v58 = vld [vmem:[%s369_s8] sm:$0xf] }
  0x13   : > { %v428_v23 = vmul.f32 %v813_v9, %v426_v20  ;;  %v429_v25 = vmul.f32 %v814_v12, %v426_v20  ;;  %v528_v39 = vand.u32 7, %v516_v35  ;;  %396 = vst.msk [vmem:[#allocation4 + $0x8] sm:$0xff] %vm394_vm0, %v885_v45  ;;  %v615_v59 = vsel %vm613_vm5, %v400_v58, 0 }
  0x14   : > { %v419_v8 = vsub.s32 %v405_v2, %v418_v5  ;;  %624 = vmatpush.bf16.msra.mxu3 %v615_v59 }
  0x15   : > { %vm545_vm4 = vcmp.le.s32.totalorder %v404_v4, %v528_v39  ;;  %v548_v46 = vld [vmem:[#allocation2] sm:$0xff] }
  0x16   : > { %vm420_vm1 = vcmp.eq.s32.totalorder %v404_v4, %v419_v8  ;;  %v549_v51 = vld [vmem:[#allocation2 + $0x8] sm:$0xff] }
  0x17   : > { %802 = vmatpush.msk.msra.mxu0 %vm420_vm1, %v882_v11  ;;  %805 = vmatpush.msk.msra.mxu1 %vm420_vm1, %v882_v11 }
  0x18   : > { %803 = vmatmul.msk.f32.vlgmr.msra.gmra.mxu0 %vm394_vm0, %v813_v9  ;;  %806 = vmatmul.msk.f32.vlgmr.msra.gmra.mxu1 %vm394_vm0, %v425_v10  ;;  %v580_v7 = vld [vmem:[#allocation3] sm:$0xff] }
  0x19   : > { %v581_v11 = vld [vmem:[#allocation3 + $0x8] sm:$0xff] }
  0x20   : > { %804 = vmatmul.msk.f32.gmra.mxu0 %vm394_vm0, %v814_v12 }
  0x95   : > { %v454_v16 = vpop.f32.mrf.mxu0  ;;  %v486_v17 = vpop.f32.mrf.mxu1 }
  0x96   : > { %v490_v18 = vmul.f32 %v489_v14, %v486_v17  ;;  %v460_v24 = vmul.f32 %v454_v16, %v427_v21 }
  0x98   : > { %v491_v19 = vadd.f32 %v490_v18, %v465_v15  ;;  %v462_v29 = vadd.f32 %v460_v24, %v428_v23  ;;  %v595_v18 = vld [vmem:[#allocation4] sm:$0xff]  ;;  %v596_v24 = vld [vmem:[#allocation4 + $0x8] sm:$0xff] }
  0x9a   : > { %v493_v22 = vpack.c.bf16 %v491_v19, %v491_v19 }
  0x9c   : > { %v498_v26 = vsel %vm394_vm0, %v493_v22, 0 }
  0x9d   : > { %v457_v27 = vpop.f32.mrf.mxu0  ;;  %507 = vmatpush.bf16.xpose.msra.mxu2 %v498_v26 }
  0x9e   : > { %v461_v28 = vmul.f32 %v457_v27, %v427_v21 }
  0xa0   : > { %v463_v30 = vadd.f32 %v461_v28, %v429_v25 }
  0xa2   : > { %v492_v31 = vpack.c.bf16 %v463_v30, %v462_v29 }
  0xa4   : > { %807 = vmatmul.msk.bf16.vlgmr.msra.gmra.mxu2 %vm394_vm0, %v492_v31 }
 0x127   : > { %v509_v34 = vpop.f32.mrf.mxu2 }
 0x128   : > { %v514_v36 = vmul.f32 0.35355338, %v509_v34 }
 0x12a   : > { %v546_v37 = vsel %vm544_vm3, %v514_v36, -1e+30 }
 0x12b   : > { %v550_v38 = vsel %vm394_vm0, %v546_v37, -inf }
 0x12c   : > { %551 = vmax.xlane.f32.xlu0 %v550_v38 }
 0x12f   : > { %v511_v40 = vpop.f32.mrf.mxu2 }
 0x130   : > { %v515_v41 = vmul.f32 0.35355338, %v511_v40 }
 0x132   : > { %v547_v42 = vsel %vm545_vm4, %v515_v41, -1e+30 }
 0x133   : > { %v553_v43 = vsel %vm394_vm0, %v547_v42, -inf }
 0x134   : > { %554 = vmax.xlane.f32.xlu0 %v553_v43 }
 0x19f   : > { %v552_v47 = vpop.xlane.xlu0 %551 }
 0x1a0   : > { %v556_v48 = vmax.f32 %v548_v46, %v552_v47 }
 0x1a2   : > { %v558_v49 = vsub.f32 %v548_v46, %v556_v48  ;;  %635 = vst.msk [vmem:[#allocation2] sm:$0xff] %vm389_vm2, %v556_v48  ;;  %566 = vperm.xlu1 %843, %v556_v48  }
 0x1a4   : > { %v560_v50 = vmul.f32 1.442695, %v558_v49 }
 0x1a6   : > { %846 = vpow2.f32 %v560_v50 }
 0x1a7   : > { %v555_v52 = vpop.xlane.xlu0 %554 }
 0x1a8   : > { %v557_v53 = vmax.f32 %v549_v51, %v555_v52 }
 0x1aa   : > { %v559_v54 = vsub.f32 %v549_v51, %v557_v53  ;;  %636 = vst.msk [vmem:[#allocation2 + $0x8] sm:$0xff] %vm389_vm2, %v557_v53  ;;  %571 = vperm.xlu1 %843, %v557_v53  }
 0x1ac   : > { %v847_v55 = vpop.eup %846  ;;  %v562_v56 = vmul.f32 1.442695, %v559_v54 }
 0x1ad   : > { %599 = vperm.xlu0 %844, %v847_v55   ;;  %v582_v8 = vmul.f32 %v847_v55, %v580_v7 }
 0x1ae   : > { %848 = vpow2.f32 %v562_v56 }
 0x1b4   : > { %v849_v57 = vpop.eup %848 }
 0x1b5   : > { %604 = vperm.xlu1 %843, %v849_v57   ;;  %v583_v12 = vmul.f32 %v849_v57, %v581_v11 }
 0x214   : > { %v567_v60 = vpop.permute.xlu1 %566 }
 0x215   : > { %v574_v61 = vsub.f32 %v546_v37, %v567_v60 }
 0x217   : > { %v576_v62 = vmul.f32 1.442695, %v574_v61 }
 0x219   : > { %850 = vpow2.f32 %v576_v62 }
 0x21c   : > { %v572_v63 = vpop.permute.xlu1 %571 }
 0x21d   : > { %v575_v0 = vsub.f32 %v547_v42, %v572_v63 }
 0x21f   : > { %v851_v1 = vpop.eup %850  ;;  %v578_v2 = vmul.f32 1.442695, %v575_v0  ;;  %v600_v19 = vpop.permute.xlu0 %599 }
 0x220   : > { %v584_v3 = vsel %vm394_vm0, %v851_v1, 0.0  ;;  %v607_v20 = vmul.f32 %v600_v19, %v595_v18 }
 0x221   : > { %852 = vpow2.f32 %v578_v2  ;;  %585 = vadd.xlane.f32.xlu2 %v584_v3 }
 0x227   : > { %v853_v4 = vpop.eup %852  ;;  %v605_v25 = vpop.permute.xlu1 %604 }
 0x228   : > { %v587_v5 = vsel %vm394_vm0, %v853_v4, 0.0  ;;  %v609_v6 = vpack.c.bf16 %v853_v4, %v851_v1  ;;  %v608_v26 = vmul.f32 %v605_v25, %v596_v24 }
 0x229   : > { %588 = vadd.xlane.f32.xlu2 %v587_v5 }
 0x22a   : > { %808 = vmatmul.msk.bf16.vlgmr.msra.gmra.mxu3 %vm394_vm0, %v609_v6 }
 0x294   : > { %v586_v9 = vpop.xlane.xlu2 %585 }
 0x295   : > { %v590_v10 = vadd.f32 %v586_v9, %v582_v8 }
 0x297   : > { %593 = vst.msk [vmem:[#allocation3] sm:$0xff] %vm389_vm2, %v590_v10 }
 0x29c   : > { %v589_v13 = vpop.xlane.xlu2 %588 }
 0x29d   : > { %v591_v14 = vadd.f32 %v589_v13, %v583_v12 }
 0x29e   : > { %v640_v15 = vld [vmem:[#allocation3] sm:$0xff] }
 0x29f   : > { %594 = vst.msk [vmem:[#allocation3 + $0x8] sm:$0xff] %vm389_vm2, %v591_v14  ;;  %854 = vrcp.f32 %v640_v15 }
 0x2a5   : > { %v855_v16 = vpop.eup %854 }
 0x2a6   : > { %648 = vperm.xlu2 %845, %v855_v16   ;;  %v641_v17 = vld [vmem:[#allocation3 + $0x8] sm:$0xff] }
 0x2a7   : > { %856 = vrcp.f32 %v641_v17 }
 0x2ad   : > { %v857_v21 = vpop.eup %856  ;;  %v626_v22 = vpop.f32.mrf.mxu3 }
 0x2ae   : > { %v631_v23 = vadd.f32 %v626_v22, %v607_v20  ;;  %653 = vperm.xlu1 %843, %v857_v21  }
 0x2b0   : > { %633 = vst.msk [vmem:[#allocation4] sm:$0xff] %vm394_vm0, %v631_v23 }
 0x2b5   : > { %v628_v27 = vpop.f32.mrf.mxu3 }
 0x2b6   : > { %v632_v28 = vadd.f32 %v628_v27, %v608_v26 }
 0x2b7   : > { %v644_v30 = vld [vmem:[#allocation4] sm:$0xff] }
 0x2b8   : > { %634 = vst.msk [vmem:[#allocation4 + $0x8] sm:$0xff] %vm394_vm0, %v632_v28 }
 0x2bf   : > { %v645_v33 = vld [vmem:[#allocation4 + $0x8] sm:$0xff] }
 0x300   : > { %v649_v29 = vpop.permute.xlu2 %648 }
 0x301   : > { %v656_v31 = vmul.f32 %v649_v29, %v644_v30 }
 0x303   : > { %v658_v32 = vpack.c.bf16 %v656_v31, %v656_v31 }
 0x305   : > { %661 = vst.msk [vmem:[%s382_s9] sm:$0xf] %vm660_vm6, %v658_v32 }
 0x320   : > { %v654_v34 = vpop.permute.xlu1 %653 }
 0x321   : > { %v657_v35 = vmul.f32 %v654_v34, %v645_v33 }
 0x323   : > { %v659_v36 = vpack.c.bf16 %v657_v35, %v657_v35 }
 0x325   : > { %662 = vst.msk [vmem:[%s382_s9 + $0x4] sm:$0xf] %vm660_vm6, %v659_v36 }
 0x326 PF: > { %s17_s26 = sadd.s32 1, %s880_s26   ;;  %s1021_s24 = smov %s876_s25 }
 0x327   : > { %p14_p6 = scmp.ge.s32.totalorder %s17_s26, 6   ;;  %s1022_s25 = smov %s1024_s27 }
 0x329   :  { %16 = sbr.rel (!%p14_p6) target bundleno = 2 (0x2), region = 98 }

// kernel: transformer_decoder.24
= control target key start
LH: loop header
LB: loop body
LE: loop exit
PB: predicated region body
PF: predicated region fallthrough
CT: control target
= control target key end

     0   :  { %vm28_vm0 = vcmask 261120   ;;  %v303_v7 = vmov 32.0   ;;  %vm76_vm5 = vcmask 257024   ;;  %v304_v54 = vmov 0.0   ;;  %s383_s0 = inlined_call_operand.vmem [shape: bf16[16,32], index: 0, kind: input, shape index: {}]   ;;  %s384_s1 = inlined_call_operand.vmem [shape: f32[1,32], index: 1, kind: input, shape index: {}]   ;;  %s385_s2 = inlined_call_operand.vmem [shape: bf16[32,64], index: 2, kind: input, shape index: {}]   ;;  %s386_s3 = inlined_call_operand.vmem [shape: bf16[64,32], index: 3, kind: input, shape index: {}]   ;;  %s387_s4 = inlined_call_operand.vmem [shape: bf16[16,32], index: 4, kind: output, shape index: {}]  }
   0x1   :  { %v279_v0 = vld [vmem:[%s383_s0] sm:$0xff]   ;;  %289 = vrcp.f32 %v303_v7  ;;  %v273_v17 = vld [vmem:[%s385_s2 + $0x8] sm:$0xff]  ;;  %v277_v44 = vld [vmem:[%s386_s3 + $0x18] sm:$0xff]  ;;  %79 = vst.msk [vmem:[#allocation3] sm:$0xff] %vm28_vm0, %v304_v54 }
   0x2   :  { %v333_v1 = vunpack.c.l.bf16 %v279_v0  ;;  %v337_v3 = vunpack.c.h.bf16 %v279_v0  ;;  %114 = vmatpush.bf16.msra.mxu0 %v273_v17  ;;  %v272_v18 = vld [vmem:[%s385_s2] sm:$0xff]  ;;  %205 = vmatpush.bf16.msra.mxu1 %v277_v44  ;;  %v276_v45 = vld [vmem:[%s386_s3 + $0x10] sm:$0xff]  ;;  %v275_v47 = vld [vmem:[%s386_s3 + $0x8] sm:$0xff]  ;;  %80 = vst.msk [vmem:[#allocation3 + $0x8] sm:$0xff] %vm28_vm0, %v304_v54 }
   0x3   :  { %v288_v30 = vld [vmem:[%s384_s1] ss:$0 sm:$0xff] }
   0x4   :  { %v26_v2 = vmul.f32 %v333_v1, %v333_v1  ;;  %v27_v5 = vmul.f32 %v337_v3, %v337_v3  ;;  %v274_v49 = vld [vmem:[%s386_s3] sm:$0xff] }
   0x6   :  { %v29_v4 = vsel %vm28_vm0, %v26_v2, 0.0  ;;  %v32_v6 = vsel %vm28_vm0, %v27_v5, 0.0  ;;  %115 = vmatpush.bf16.msra.mxu0 %v272_v18  ;;  %206 = vmatpush.bf16.msra.mxu1 %v276_v45 }
   0x7   :  { %30 = vadd.xlane.f32.xlu0 %v29_v4  ;;  %v290_v8 = vpop.eup %289 }
   0x8   :  { %v36_v9 = vmul.f32 32.0, %v290_v8  ;;  %vm40_vm1 = vweird.f32 %v290_v8  ;;  %v162_v18 = vld [vmem:[#allocation3] sm:$0xff] }
   0xa   :  { %v37_v10 = vsub.f32 1.0, %v36_v9  ;;  %207 = vmatpush.bf16.msra.mxu1 %v275_v47 }
   0xc   :  { %v38_v11 = vmul.f32 %v290_v8, %v37_v10 }
   0xe   :  { %v39_v12 = vadd.f32 %v290_v8, %v38_v11  ;;  %208 = vmatpush.bf16.msra.mxu1 %v274_v49 }
   0xf   :  { %33 = vadd.xlane.f32.xlu0 %v32_v6 }
  0x10   :  { %v41_v13 = vsel %vm40_vm1, %v290_v8, %v39_v12 }
  0x7a   :  { %v31_v14 = vpop.xlane.xlu0 %30 }
  0x7b   :  { %v42_v15 = vmul.f32 %v41_v13, %v31_v14 }
  0x7d   :  { %v44_v16 = vadd.f32 1e-06, %v42_v15 }
  0x7f   :  { %291 = vrsqrt.f32 %v44_v16  ;;  %vm52_vm3 = vweird.f32 %v44_v16 }
  0x82   :  { %v34_v19 = vpop.xlane.xlu0 %33 }
  0x83   :  { %v43_v20 = vmul.f32 %v41_v13, %v34_v19 }
  0x85   :  { %v292_v21 = vpop.eup %291  ;;  %v45_v22 = vadd.f32 1e-06, %v43_v20 }
  0x86   :  { %v47_v23 = vmul.f32 %v292_v21, %v44_v16  ;;  %vm53_vm2 = vweird.f32 %v292_v21 }
  0x87   :  { %293 = vrsqrt.f32 %v45_v22  ;;  %vm54_vm4 = vmor %vm52_vm3, %vm53_vm2  ;;  %vm62_vm7 = vweird.f32 %v45_v22  ;;  %vm197_vm2 = vcmask 523264  }
  0x88   :  { %v48_v24 = vmul.f32 %v292_v21, %v47_v23 }
  0x8a   :  { %v49_v25 = vmul.f32 0.5, %v48_v24 }
  0x8c   :  { %v50_v26 = vsub.f32 1.5, %v49_v25 }
  0x8d   :  { %v294_v27 = vpop.eup %293 }
  0x8e   :  { %v51_v28 = vmul.f32 %v292_v21, %v50_v26  ;;  %v57_v29 = vmul.f32 %v294_v27, %v45_v22  ;;  %vm63_vm6 = vweird.f32 %v294_v27 }
  0x8f   :  { %vm64_vm8 = vmor %vm62_vm7, %vm63_vm6 }
  0x90   :  { %v55_v31 = vsel %vm54_vm4, %v292_v21, %v51_v28  ;;  %v58_v32 = vmul.f32 %v294_v27, %v57_v29  ;;  %v163_v21 = vld [vmem:[#allocation3 + $0x8] sm:$0xff] }
  0x91   :  { %v66_v33 = vmul.f32 %v333_v1, %v55_v31 }
  0x92   :  { %v59_v34 = vmul.f32 0.5, %v58_v32 }
  0x93   :  { %v72_v35 = vmul.f32 %v288_v30, %v66_v33 }
  0x94   :  { %v60_v36 = vsub.f32 1.5, %v59_v34 }
  0x95   :  { %v74_v37 = vpack.c.bf16 %v72_v35, %v72_v35 }
  0x96   :  { %v61_v38 = vmul.f32 %v294_v27, %v60_v36 }
  0x97   :  { %77 = vst.msk [vmem:[#allocation2] sm:$0xf] %vm76_vm5, %v74_v37 }
  0x98   :  { %v65_v39 = vsel %vm64_vm8, %v294_v27, %v61_v38 }
  0x99   :  { %v67_v40 = vmul.f32 %v337_v3, %v65_v39 }
  0x9b   :  { %v73_v41 = vmul.f32 %v288_v30, %v67_v40 }
  0x9d   :  { %v75_v42 = vpack.c.bf16 %v73_v41, %v73_v41 }
  0x9f   :  { %78 = vst.msk [vmem:[#allocation2 + $0x4] sm:$0xf] %vm76_vm5, %v75_v42 }
  0xa6   :  { %v271_v43 = vld [vmem:[#allocation2] sm:$0xff] }
  0xa7   :  { %251 = vmatmul.msk.bf16.vlgmr.msra.gmra.mxu0 %vm28_vm0, %v271_v43 }
 0x124   :  { %v117_v46 = vpop.f32.mrf.mxu0 }
 0x125   :  { %v252_v48 = vmul.f32 -1.442695, %v117_v46 }
 0x127   :  { %295 = vpow2.f32 %v252_v48 }
 0x12c   :  { %v119_v50 = vpop.f32.mrf.mxu0 }
 0x12d   :  { %v296_v51 = vpop.eup %295  ;;  %v253_v52 = vmul.f32 -1.442695, %v119_v50 }
 0x12e   :  { %v128_v53 = vadd.f32 1.0, %v296_v51 }
 0x12f   :  { %297 = vpow2.f32 %v253_v52 }
 0x130   :  { %299 = vrcp.f32 %v128_v53  ;;  %v141_v0 = vand.u32 2147483648, %v128_v53  ;;  %vm135_vm10 = vweird.f32 %v128_v53  ;;  %v139_v2 = vand.u32 2147483647, %v128_v53 }
 0x132   :  { %v142_v9 = vor.u32 1.1754944e-38, %v141_v0  ;;  %vm140_vm13 = vcmp.eq.f32.partialorder %v139_v2, 8.507059e+37 }
 0x135   :  { %v298_v55 = vpop.eup %297 }
 0x136   :  { %v300_v56 = vpop.eup %299  ;;  %v129_v57 = vadd.f32 1.0, %v298_v55 }
 0x137   :  { %v131_v58 = vmul.f32 %v300_v56, %v128_v53  ;;  %vm136_vm9 = vweird.f32 %v300_v56 }
 0x138   :  { %301 = vrcp.f32 %v129_v57  ;;  %vm137_vm11 = vmor %vm135_vm10, %vm136_vm9  ;;  %v156_v5 = vand.u32 2147483648, %v129_v57  ;;  %v154_v8 = vand.u32 2147483647, %v129_v57  ;;  %vm150_vm14 = vweird.f32 %v129_v57 }
 0x139   :  { %v132_v59 = vsub.f32 1.0, %v131_v58 }
 0x13a   :  { %v157_v12 = vor.u32 1.1754944e-38, %v156_v5  ;;  %vm155_vm1 = vcmp.eq.f32.partialorder %v154_v8, 8.507059e+37 }
 0x13b   :  { %v133_v60 = vmul.f32 %v300_v56, %v132_v59 }
 0x13d   :  { %v134_v62 = vadd.f32 %v300_v56, %v133_v60 }
 0x13e   :  { %v302_v61 = vpop.eup %301 }
 0x13f   :  { %v146_v63 = vmul.f32 %v302_v61, %v129_v57  ;;  %v138_v6 = vsel %vm137_vm11, %v300_v56, %v134_v62  ;;  %vm151_vm12 = vweird.f32 %v302_v61 }
 0x140   :  { %v143_v11 = vsel %vm140_vm13, %v142_v9, %v138_v6  ;;  %vm152_vm15 = vmor %vm150_vm14, %vm151_vm12 }
 0x141   :  { %v147_v4 = vsub.f32 1.0, %v146_v63  ;;  %v160_v15 = vmul.f32 %v143_v11, %v117_v46 }
 0x143   :  { %v148_v7 = vmul.f32 %v302_v61, %v147_v4 }
 0x145   :  { %v149_v10 = vadd.f32 %v302_v61, %v148_v7 }
 0x147   :  { %v153_v13 = vsel %vm152_vm15, %v302_v61, %v149_v10 }
 0x148   :  { %v158_v14 = vsel %vm155_vm1, %v157_v12, %v153_v13 }
 0x149   :  { %v161_v16 = vmul.f32 %v158_v14, %v119_v50 }
 0x14b   :  { %v164_v17 = vpack.c.bf16 %v161_v16, %v160_v15 }
 0x14d   :  { %270 = vmatmul.msk.bf16.vlgmr.msra.gmra.mxu1 %vm197_vm2, %v164_v17 }
 0x1ca   :  { %v210_v19 = vpop.f32.mrf.mxu1 }
 0x1cb   :  { %v215_v20 = vadd.f32 %v210_v19, %v162_v18 }
 0x1cd   :  { %217 = vst.msk [vmem:[#allocation3] sm:$0xff] %vm28_vm0, %v215_v20 }
 0x1d2   :  { %v212_v22 = vpop.f32.mrf.mxu1 }
 0x1d3   :  { %v216_v23 = vadd.f32 %v212_v22, %v163_v21 }
 0x1d4   :  { %v222_v24 = vld [vmem:[#allocation3] sm:$0xff] }
 0x1d5   :  { %v228_v25 = vadd.f32 %v333_v1, %v222_v24  ;;  %218 = vst.msk [vmem:[#allocation3 + $0x8] sm:$0xff] %vm28_vm0, %v216_v23 }
 0x1d7   :  { %v230_v26 = vpack.c.bf16 %v228_v25, %v228_v25 }
 0x1d9   :  { %233 = vst.msk [vmem:[%s387_s4] sm:$0xf] %vm76_vm5, %v230_v26 }
 0x1dc   :  { %v223_v27 = vld [vmem:[#allocation3 + $0x8] sm:$0xff] }
 0x1dd   :  { %v229_v28 = vadd.f32 %v337_v3, %v223_v27 }
 0x1df   :  { %v231_v29 = vpack.c.bf16 %v229_v28, %v229_v28 }
 0x1e1   :  { %234 = vst.msk [vmem:[%s387_s4 + $0x4] sm:$0xf] %vm76_vm5, %v231_v29 }

// kernel: transformer_decoder.26
= control target key start
LH: loop header
LB: loop body
LE: loop exit
PB: predicated region body
PF: predicated region fallthrough
CT: control target
= control target key end

     0   :  { %vm35_vm0 = vcmask 261120   ;;  %vm55_vm1 = vcmask 257024   ;;  %s108_s1 = inlined_call_operand.vmem [shape: bf16[32,32], index: 1, kind: input, shape index: {}]   ;;  %s109_s0 = inlined_call_operand.vmem [shape: bf16[16,32], index: 0, kind: input, shape index: {}]   ;;  %s110_s2 = inlined_call_operand.vmem [shape: bf16[16,32], index: 2, kind: output, shape index: {}]  }
   0x1   :  { %v77_v0 = vld [vmem:[%s108_s1 + $0x8] sm:$0xff]  ;;  %v76_v1 = vld [vmem:[%s108_s1] sm:$0xff] }
   0x2   :  { %45 = vmatpush.bf16.msra.mxu0 %v77_v0  ;;  %v75_v2 = vld [vmem:[%s109_s0] sm:$0xff] }
   0x6   :  { %46 = vmatpush.bf16.msra.mxu0 %v76_v1 }
   0x9   :  { %74 = vmatmul.msk.bf16.vlgmr.msra.gmra.mxu0 %vm35_vm0, %v75_v2 }
  0x86   :  { %v48_v3 = vpop.f32.mrf.mxu0 }
  0x87   :  { %v53_v4 = vpack.c.bf16 %v48_v3, %v48_v3 }
  0x89   :  { %56 = vst.msk [vmem:[%s110_s2] sm:$0xf] %vm55_vm1, %v53_v4 }
  0x8e   :  { %v50_v5 = vpop.f32.mrf.mxu0 }
  0x8f   :  { %v54_v6 = vpack.c.bf16 %v50_v5, %v50_v5 }
  0x91   :  { %57 = vst.msk [vmem:[%s110_s2 + $0x4] sm:$0xf] %vm55_vm1, %v54_v6 }

// kernel: transformer_decoder.39
= control target key start
LH: loop header
LB: loop body
LE: loop exit
PB: predicated region body
PF: predicated region fallthrough
CT: control target
= control target key end

     0   :  { %s156_s0 = inlined_call_operand.vmem [shape: bf16[16,32], index: 0, kind: input, shape index: {}]   ;;  %s157_s1 = inlined_call_operand.vmem [shape: f32[1,32], index: 1, kind: input, shape index: {}]   ;;  %s158_s2 = inlined_call_operand.hbm [shape: bf16[16,32], index: 2, kind: output, shape index: {}]  }
   0x1   :  { %v88_v0 = vld [vmem:[%s156_s0] sm:$0xff]  }
   0x2   :  { %v89_v1 = vunpack.c.l.bf16 %v88_v0 }
   0x3   :  { %7 = vsyncpa [#allocation3], 0  ;;  %vm18_vm0 = vcmask 261120   ;;  %v90_v3 = vunpack.c.h.bf16 %v88_v0  ;;  %v128_v7 = vmov 32.0   ;;  %v95_v28 = vld [vmem:[%s157_s1] ss:$0 sm:$0xff] }
   0x4   :  { %v16_v2 = vmul.f32 %v89_v1, %v89_v1  ;;  %96 = vrcp.f32 %v128_v7  ;;  %vm66_vm6 = vcmask 257024   ;;  %s129_s12 = smov [#allocation2]   ;;  %s75_s15 = sshll.u32 %s158_s2, 4  ;;  %s76_s15 = int_to_ptr.hbm [resolvable:$true] %s75_s15 }
   0x5   :  { %v17_v5 = vmul.f32 %v90_v3, %v90_v3  ;;  %s73_s13 = sshll.u32 %s129_s12, 4  ;;  %s130_s16 = smov 64   ;;  %s74_s13 = int_to_ptr.vmem [resolvable:$true] %s73_s13 }
   0x6   :  { %v19_v4 = vsel %vm18_vm0, %v16_v2, 0.0  ;;  %s131_s17 = smov 4  }
   0x7   :  { %20 = vadd.xlane.f32.xlu0 %v19_v4  ;;  %v22_v6 = vsel %vm18_vm0, %v17_v5, 0.0 }
   0xa   :  { %v97_v8 = vpop.eup %96 }
   0xb   :  { %v26_v9 = vmul.f32 32.0, %v97_v8  ;;  %vm30_vm1 = vweird.f32 %v97_v8 }
   0xd   :  { %v27_v10 = vsub.f32 1.0, %v26_v9 }
   0xf   :  { %23 = vadd.xlane.f32.xlu0 %v22_v6  ;;  %v28_v11 = vmul.f32 %v97_v8, %v27_v10 }
  0x11   :  { %v29_v12 = vadd.f32 %v97_v8, %v28_v11 }
  0x13   :  { %v31_v13 = vsel %vm30_vm1, %v97_v8, %v29_v12 }
  0x7a   :  { %v21_v14 = vpop.xlane.xlu0 %20 }
  0x7b   :  { %v32_v15 = vmul.f32 %v31_v13, %v21_v14 }
  0x7d   :  { %v34_v16 = vadd.f32 1e-06, %v32_v15 }
  0x7f   :  { %98 = vrsqrt.f32 %v34_v16  ;;  %vm42_vm3 = vweird.f32 %v34_v16 }
  0x82   :  { %v24_v17 = vpop.xlane.xlu0 %23 }
  0x83   :  { %v33_v18 = vmul.f32 %v31_v13, %v24_v17 }
  0x85   :  { %v99_v19 = vpop.eup %98  ;;  %v35_v20 = vadd.f32 1e-06, %v33_v18 }
  0x86   :  { %v37_v21 = vmul.f32 %v99_v19, %v34_v16  ;;  %vm43_vm2 = vweird.f32 %v99_v19 }
  0x87   :  { %100 = vrsqrt.f32 %v35_v20  ;;  %vm44_vm4 = vmor %vm42_vm3, %vm43_vm2  ;;  %vm52_vm7 = vweird.f32 %v35_v20 }
  0x88   :  { %v38_v22 = vmul.f32 %v99_v19, %v37_v21 }
  0x8a   :  { %v39_v23 = vmul.f32 0.5, %v38_v22 }
  0x8c   :  { %v40_v24 = vsub.f32 1.5, %v39_v23 }
  0x8d   :  { %v101_v25 = vpop.eup %100 }
  0x8e   :  { %v41_v26 = vmul.f32 %v99_v19, %v40_v24  ;;  %v47_v27 = vmul.f32 %v101_v25, %v35_v20  ;;  %vm53_vm5 = vweird.f32 %v101_v25 }
  0x8f   :  { %vm54_vm8 = vmor %vm52_vm7, %vm53_vm5 }
  0x90   :  { %v45_v29 = vsel %vm44_vm4, %v99_v19, %v41_v26  ;;  %v48_v30 = vmul.f32 %v101_v25, %v47_v27 }
  0x91   :  { %v56_v31 = vmul.f32 %v89_v1, %v45_v29 }
  0x92   :  { %v49_v32 = vmul.f32 0.5, %v48_v30 }
  0x93   :  { %v62_v33 = vmul.f32 %v95_v28, %v56_v31 }
  0x94   :  { %v50_v34 = vsub.f32 1.5, %v49_v32 }
  0x95   :  { %v64_v35 = vpack.c.bf16 %v62_v33, %v62_v33 }
  0x96   :  { %v51_v36 = vmul.f32 %v101_v25, %v50_v34 }
  0x97   :  { %67 = vst.msk [vmem:[#allocation2] sm:$0xf] %vm66_vm6, %v64_v35 }
  0x98   :  { %v55_v37 = vsel %vm54_vm8, %v101_v25, %v51_v36 }
  0x99   :  { %v57_v38 = vmul.f32 %v90_v3, %v55_v37 }
  0x9b   :  { %v63_v39 = vmul.f32 %v95_v28, %v57_v38 }
  0x9d   :  { %v65_v40 = vpack.c.bf16 %v63_v39, %v63_v39 }
  0x9f   :  { %68 = vst.msk [vmem:[#allocation2 + $0x4] sm:$0xf] %vm66_vm6, %v65_v40 }
  0xa0   :  { %81 = dma.vmem_to_hbm [thread:$0]  %s74_s13, 128, %s76_s15, [#allocation3], %s130_s16, %s130_s16, %s131_s17  }
  0xa1   :  { %126 = dma.done.wait [#allocation3], 128  }
  0xa2   :  { %127 = vsyncadd [#allocation3], 4294967168 }
  0xa3   :  { %86 = vsyncpa [#allocation3], 1 }

// kernel: transformer_decoder.27
= control target key start
LH: loop header
LB: loop body
LE: loop exit
PB: predicated region body
PF: predicated region fallthrough
CT: control target
= control target key end

     0   :  { %s606_s12 = smov 0   ;;  %s608_s13 = smov 0   ;;  %s678_s0 = inlined_call_operand.vmem [shape: bf16[8,8,8], index: 0, kind: input, shape index: {}]   ;;  %s679_s1 = inlined_call_operand.vmem [shape: bf16[4,8,8], index: 1, kind: input, shape index: {}]   ;;  %s680_s2 = inlined_call_operand.vmem [shape: bf16[4,8,8], index: 2, kind: input, shape index: {}]   ;;  %s681_s3 = inlined_call_operand.vmem [shape: bf16[8,8,8], index: 3, kind: output, shape index: {}]  }
   0x1   :  { %s610_s14 = smov 0  }
   0x2 LB: > { %s25_s15 = sadd.s32 1, %s577_s13  ;;  %p501_p0 = scmp.ge.s32.totalorder %s581_s14, 1  ;;  %s581_s14 = sphi %s610_s14, %s13_s14   ;;  %s577_s13 = sphi %s608_s13, %s683_s13   ;;  %s573_s12 = sphi %s606_s12, %s682_s12  }
   0x3   : > { %p27_p1 = scmp.ge.s32.totalorder %s25_s15, 4  ;;  %p178_p2 = scmp.lt.s32.totalorder %s581_s14, 5 }
   0x5   : > { %s685_s15 = smov (%p27_p1, %s25_s15), 0  ;;  %p179_p3 = pnand %p501_p0, %p178_p2 }
   0x6   : > { %p222_p4 = scmp.lt.s32.totalorder (!%p179_p3), %s573_s12, 3  ;;  %s502_s16 = sshll.u32 (!%p179_p3), %s573_s12, 1 }
   0x7   : > { %182 = sbr.rel (%p179_p3) target bundleno = 659 (0x293), region = 32  ;;  %p217_p5 = scmp.lt.s32.totalorder (!%p179_p3), %s502_s16, 7 }
   0xc   : > { %s687_s12 = smov (!%p222_p4, %s573_s12), 3  ;;  %s689_s16 = smov (!%p217_p5, %s502_s16), 7  ;;  %vm252_vm0 = vcmask 64512   ;;  %vm247_vm1 = vcmask 7168   ;;  %v583_v3 = vmov -1e+30  }
   0xd   : > { %s504_s17 = sshll.u32 %s687_s12, 2  ;;  %s503_s21 = sshll.u32 %s689_s16, 2  ;;  %248 = vst.msk [vmem:[#allocation2] sm:$0xff] %vm247_vm1, %v583_v3  ;;  %v584_v10 = vmov 0   ;;  %v585_v11 = vmov 0.0   ;;  %vm352_vm2 = vcmask 1043456  }
   0xe   : > { %s228_s20 = scalar_lea.vmem %s679_s1, %s504_s17  ;;  %s220_s24 = scalar_lea.vmem %s678_s0, %s503_s21  ;;  %249 = vst.msk [vmem:[#allocation2 + $0x8] sm:$0xff] %vm247_vm1, %v583_v3  ;;  %544 = vset.pattern.permute.xlu1 %v584_v10  ;;  %545 = vset.pattern.permute.xlu0 %v584_v10  ;;  %vm399_vm3 = vcmask 60416  }
   0xf   : > { %v257_v0 = vld [vmem:[%s228_s20] sm:$0xf]  ;;  %546 = vset.pattern.permute.xlu2 %v584_v10  ;;  %253 = vst.msk [vmem:[#allocation4] sm:$0xff] %vm252_vm0, %v585_v11  ;;  %s235_s27 = scalar_lea.vmem %s680_s2, %s504_s17  ;;  %s240_s30 = scalar_lea.vmem %s681_s3, %s503_s21 }
  0x10   : > { %v269_v1 = vsel %vm252_vm0, %v257_v0, 0  ;;  %v516_v2 = vld [vmem:[%s220_s24] sm:$0xff]  ;;  %250 = vst.msk [vmem:[#allocation3] sm:$0xff] %vm247_vm1, %v585_v11 }
  0x11   : > { %278 = vmatpush.bf16.xpose.msra.mxu0 %v269_v1  ;;  %251 = vst.msk [vmem:[#allocation3 + $0x8] sm:$0xff] %vm247_vm1, %v585_v11  ;;  %v258_v24 = vld [vmem:[%s235_s27] sm:$0xf] }
  0x12   : > { %254 = vst.msk [vmem:[#allocation4 + $0x8] sm:$0xff] %vm252_vm0, %v585_v11  ;;  %v354_v25 = vsel %vm352_vm2, %v258_v24, 0 }
  0x13   : > { %363 = vmatpush.bf16.msra.mxu1 %v354_v25 }
  0x14   : > { %v287_v12 = vld [vmem:[#allocation2] sm:$0xff] }
  0x15   : > { %v288_v17 = vld [vmem:[#allocation2 + $0x8] sm:$0xff] }
  0x16   : > { %v334_v46 = vld [vmem:[#allocation4] sm:$0xff] }
  0x17   : > { %v319_v37 = vld [vmem:[#allocation3] sm:$0xff] }
  0x18   : > { %512 = vmatmul.msk.bf16.vlgmr.msra.gmra.mxu0 %vm252_vm0, %v516_v2  ;;  %v320_v41 = vld [vmem:[#allocation3 + $0x8] sm:$0xff] }
  0x19   : > { %v335_v53 = vld [vmem:[#allocation4 + $0x8] sm:$0xff] }
  0x95   : > { %v280_v4 = vpop.f32.mrf.mxu0 }
  0x96   : > { %v285_v5 = vmul.f32 0.35355338, %v280_v4 }
  0x98   : > { %v289_v6 = vsel %vm252_vm0, %v285_v5, -inf }
  0x99   : > { %290 = vmax.xlane.f32.xlu0 %v289_v6 }
  0x9d   : > { %v282_v7 = vpop.f32.mrf.mxu0 }
  0x9e   : > { %v286_v8 = vmul.f32 0.35355338, %v282_v7 }
  0xa0   : > { %v292_v9 = vsel %vm252_vm0, %v286_v8, -inf }
  0xa1   : > { %293 = vmax.xlane.f32.xlu0 %v292_v9 }
 0x10c   : > { %v291_v13 = vpop.xlane.xlu0 %290 }
 0x10d   : > { %v295_v14 = vmax.f32 %v287_v12, %v291_v13 }
 0x10f   : > { %v297_v15 = vsub.f32 %v287_v12, %v295_v14  ;;  %374 = vst.msk [vmem:[#allocation2] sm:$0xff] %vm247_vm1, %v295_v14  ;;  %305 = vperm.xlu1 %544, %v295_v14  }
 0x111   : > { %v299_v16 = vmul.f32 1.442695, %v297_v15 }
 0x113   : > { %547 = vpow2.f32 %v299_v16 }
 0x114   : > { %v294_v18 = vpop.xlane.xlu0 %293 }
 0x115   : > { %v296_v19 = vmax.f32 %v288_v17, %v294_v18 }
 0x117   : > { %v298_v20 = vsub.f32 %v288_v17, %v296_v19  ;;  %375 = vst.msk [vmem:[#allocation2 + $0x8] sm:$0xff] %vm247_vm1, %v296_v19  ;;  %310 = vperm.xlu1 %544, %v296_v19  }
 0x119   : > { %v548_v21 = vpop.eup %547  ;;  %v301_v22 = vmul.f32 1.442695, %v298_v20 }
 0x11a   : > { %338 = vperm.xlu0 %545, %v548_v21   ;;  %v321_v38 = vmul.f32 %v548_v21, %v319_v37 }
 0x11b   : > { %549 = vpow2.f32 %v301_v22 }
 0x121   : > { %v550_v23 = vpop.eup %549 }
 0x122   : > { %343 = vperm.xlu1 %544, %v550_v23   ;;  %v322_v42 = vmul.f32 %v550_v23, %v320_v41 }
 0x181   : > { %v306_v26 = vpop.permute.xlu1 %305 }
 0x182   : > { %v313_v27 = vsub.f32 %v285_v5, %v306_v26 }
 0x184   : > { %v315_v28 = vmul.f32 1.442695, %v313_v27 }
 0x186   : > { %551 = vpow2.f32 %v315_v28 }
 0x189   : > { %v311_v29 = vpop.permute.xlu1 %310 }
 0x18a   : > { %v314_v30 = vsub.f32 %v286_v8, %v311_v29 }
 0x18c   : > { %v552_v31 = vpop.eup %551  ;;  %v317_v32 = vmul.f32 1.442695, %v314_v30  ;;  %v339_v47 = vpop.permute.xlu0 %338 }
 0x18d   : > { %v323_v33 = vsel %vm252_vm0, %v552_v31, 0.0  ;;  %v346_v49 = vmul.f32 %v339_v47, %v334_v46 }
 0x18e   : > { %553 = vpow2.f32 %v317_v32  ;;  %324 = vadd.xlane.f32.xlu2 %v323_v33 }
 0x194   : > { %v554_v34 = vpop.eup %553  ;;  %v344_v54 = vpop.permute.xlu1 %343 }
 0x195   : > { %v326_v35 = vsel %vm252_vm0, %v554_v34, 0.0  ;;  %v348_v36 = vpack.c.bf16 %v554_v34, %v552_v31  ;;  %v347_v56 = vmul.f32 %v344_v54, %v335_v53 }
 0x196   : > { %327 = vadd.xlane.f32.xlu2 %v326_v35 }
 0x197   : > { %513 = vmatmul.msk.bf16.vlgmr.msra.gmra.mxu1 %vm252_vm0, %v348_v36 }
 0x201   : > { %v325_v39 = vpop.xlane.xlu2 %324 }
 0x202   : > { %v329_v40 = vadd.f32 %v325_v39, %v321_v38 }
 0x204   : > { %332 = vst.msk [vmem:[#allocation3] sm:$0xff] %vm247_vm1, %v329_v40 }
 0x209   : > { %v328_v43 = vpop.xlane.xlu2 %327 }
 0x20a   : > { %v330_v44 = vadd.f32 %v328_v43, %v322_v42 }
 0x20b   : > { %v379_v45 = vld [vmem:[#allocation3] sm:$0xff] }
 0x20c   : > { %333 = vst.msk [vmem:[#allocation3 + $0x8] sm:$0xff] %vm247_vm1, %v330_v44  ;;  %555 = vrcp.f32 %v379_v45 }
 0x212   : > { %v556_v48 = vpop.eup %555 }
 0x213   : > { %387 = vperm.xlu2 %546, %v556_v48   ;;  %v380_v50 = vld [vmem:[#allocation3 + $0x8] sm:$0xff] }
 0x214   : > { %v365_v51 = vpop.f32.mrf.mxu1  ;;  %557 = vrcp.f32 %v380_v50 }
 0x215   : > { %v370_v52 = vadd.f32 %v365_v51, %v346_v49 }
 0x217   : > { %372 = vst.msk [vmem:[#allocation4] sm:$0xff] %vm252_vm0, %v370_v52 }
 0x21a   : > { %v558_v55 = vpop.eup %557 }
 0x21b   : > { %392 = vperm.xlu1 %544, %v558_v55  }
 0x21c   : > { %v367_v57 = vpop.f32.mrf.mxu1 }
 0x21d   : > { %v371_v58 = vadd.f32 %v367_v57, %v347_v56 }
 0x21e   : > { %v383_v60 = vld [vmem:[#allocation4] sm:$0xff] }
 0x21f   : > { %373 = vst.msk [vmem:[#allocation4 + $0x8] sm:$0xff] %vm252_vm0, %v371_v58 }
 0x226   : > { %v384_v63 = vld [vmem:[#allocation4 + $0x8] sm:$0xff] }
 0x26d   : > { %v388_v59 = vpop.permute.xlu2 %387 }
 0x26e   : > { %v395_v61 = vmul.f32 %v388_v59, %v383_v60 }
 0x270   : > { %v397_v62 = vpack.c.bf16 %v395_v61, %v395_v61 }
 0x272   : > { %400 = vst.msk [vmem:[%s240_s30] sm:$0xf] %vm399_vm3, %v397_v62 }
 0x28d   : > { %v393_v0 = vpop.permute.xlu1 %392 }
 0x28e   : > { %v396_v1 = vmul.f32 %v393_v0, %v384_v63 }
 0x290   : > { %v398_v2 = vpack.c.bf16 %v396_v1, %v396_v1 }
 0x292   : > { %401 = vst.msk [vmem:[%s240_s30 + $0x4] sm:$0xf] %vm399_vm3, %v398_v2 }
 0x293 PF: > { %s13_s14 = sadd.s32 1, %s581_s14   ;;  %s682_s12 = smov %s577_s13 }
 0x294   : > { %p10_p6 = scmp.ge.s32.totalorder %s13_s14, 6   ;;  %s683_s13 = smov %s685_s15 }
 0x296   :  { %12 = sbr.rel (!%p10_p6) target bundleno = 2 (0x2), region = 76 }

</bundles_post_ra>
